<compile_context>
chip_gen: v6e
topology: v6e:2x2x1
jax: 0.10.0
libtpu: 0.0.40
codegen_flags: <defaults>
</compile_context>

<pallas_src>
import math
import functools

import numpy as np
import jax
import jax.numpy as jnp
from jax.experimental import pallas as pl
from jax.experimental.pallas import tpu as pltpu

LANE = 128


def _round_up(x, m):
    return ((x + m - 1) // m) * m


# ------------------------------ Pallas kernel --------------------------------

def _equal_conv2d_kernel(*refs, kh, kw, stride, block_h, wo_blk, win_h):
    """One grid step: out rows [hh*block_h, (hh+1)*block_h), Cout tile nn.

    refs = win_h squeezed input-row refs (Wp, cin_p) bf16  (the same padded
           activation array passed win_h times with shifted H index_maps),
           weight ref (kh*kw, cin_p, tn) bf16,
           bias ref (1, tn) f32,
           output ref (block_h*wo_blk, tn) out_dtype,
           acc ref (block_h*wo_blk, tn) f32 VMEM scratch.

    Implicit im2col: for each tap (ki, kj) the LHS slab is the concatenation of
    block_h shifted row windows -> one (block_h*wo_blk, cin_p) @ (cin_p, tn)
    MXU dot, accumulated in f32 in the VMEM scratch.
    """
    x_refs = refs[:win_h]
    w_ref = refs[win_h]
    b_ref = refs[win_h + 1]
    o_ref = refs[win_h + 2]
    acc_ref = refs[win_h + 3]

    def row_window(r, kj):
        # TODO(synk): for stride > 1 a one-time even/odd W de-interleave per
        # fetched row would replace these strided slices (less XLU pressure).
        if stride == 1:
            return x_refs[r][pl.ds(kj, wo_blk), :]
        return x_refs[r][pl.ds(kj, wo_blk, stride), :]

    first = True
    for ki in range(kh):
        for kj in range(kw):
            lhs = jnp.concatenate(
                [row_window(hr * stride + ki, kj) for hr in range(block_h)],
                axis=0)                                  # (block_h*wo_blk, cin_p)
            tap = jnp.dot(lhs, w_ref[ki * kw + kj],
                          preferred_element_type=jnp.float32)
            if first:
                acc_ref[...] = tap
                first = False
            else:
                acc_ref[...] += tap
    o_ref[...] = (acc_ref[...] + b_ref[...]).astype(o_ref.dtype)


# ------------------------------- wrapper --------------------------------------

def equal_conv2d(x, weight_oihw, bias=None, *, stride=1, padding=0, lr_mul=1.0,
                 groups=1, block_h=8, cout_tile=None, out_dtype=jnp.float32,
                 channels_last=False, vmem_limit_bytes=48 * 1024 * 1024):
    """EqualConv2d forward: conv2d(x, weight * scale, bias, stride, padding).

    Matches the PyTorch module: scale = lr_mul / sqrt(fan_in); the PyTorch
    forward passes `self.bias` (NOT bias * lr_mul) to F.conv2d, so the bias is
    used as-is here too.  Math runs in bf16 on the MXU with f32 accumulation
    (~1e-2 relative vs an f32 conv; not bit-identical to PyTorch).
    """
    if groups != 1:
        # TODO(synk): grouped EqualConv2d (groups > 1) not implemented in Pallas path.
        raise NotImplementedError("groups != 1 is not supported")

    O, I, kh, kw = weight_oihw.shape
    if channels_last:
        B, H, W, Cin = x.shape
        x_nhwc = x
    else:
        B, Cin, H, W = x.shape
        x_nhwc = jnp.transpose(x, (0, 2, 3, 1))
    assert I == Cin, (I, Cin)
    scale = lr_mul / math.sqrt(I * kh * kw)

    Hp, Wp = H + 2 * padding, W + 2 * padding
    Ho = (Hp - kh) // stride + 1
    Wo = (Wp - kw) // stride + 1
    assert Ho > 0 and Wo > 0, (Ho, Wo)

    # --- tiling -----------------------------------------------------------
    cin_p = _round_up(Cin, 16)            # GEMM K, bf16 sublane packing
    cout_p = _round_up(O, LANE)           # lane-dense GEMM N
    if cout_tile is not None:
        tn = cout_tile
    elif cout_p <= 4 * LANE:
        tn = cout_p                       # single 128..512-wide N tile
    elif cout_p % (4 * LANE) == 0:
        tn = 4 * LANE                     # 512-wide fills the 256-wide MXU
    elif cout_p % (2 * LANE) == 0:
        tn = 2 * LANE
    else:
        tn = LANE                         # last resort (and the v5e default)
    n_tiles = cout_p // tn

    th = max(1, min(block_h, Ho))         # output rows per grid step
    n_h = pl.cdiv(Ho, th)
    ho_p = n_h * th                       # grid-padded output rows (cropped)
    wo_p = _round_up(Wo, 8)               # sublane-aligned output columns
    hstep = th * stride
    win_h = (th - 1) * stride + kh        # padded input rows touched per step

    # --- glue: NHWC, bf16 BEFORE padding, spatial + channel zero-pad -------
    hp_full = max(Hp, (ho_p - 1) * stride + kh)
    wp_full = max(Wp, (wo_p - 1) * stride + kw)
    xb = jnp.pad(x_nhwc.astype(jnp.bfloat16),
                 ((0, 0), (padding, padding + hp_full - Hp),
                  (padding, padding + wp_full - Wp), (0, cin_p - Cin)))

    # OIHW -> (kh*kw, Cin_p, Cout_p), pre-scaled, zero-padded, bf16.
    w = jnp.transpose(weight_oihw.astype(jnp.float32) * scale, (2, 3, 1, 0))
    w = jnp.pad(w, ((0, 0), (0, 0), (0, cin_p - Cin), (0, cout_p - O)))
    w = w.reshape(kh * kw, cin_p, cout_p).astype(jnp.bfloat16)

    if bias is None:
        b = jnp.zeros((1, cout_p), jnp.float32)
    else:
        b = jnp.pad(bias.astype(jnp.float32), (0, cout_p - O)).reshape(1, cout_p)

    kern = functools.partial(_equal_conv2d_kernel, kh=kh, kw=kw, stride=stride,
                             block_h=th, wo_blk=wo_p, win_h=win_h)

    # win_h views of the same padded activation, shifted by r rows in H: the
    # (th*stride + kh - stride)-row window of one step, fetched once.
    in_specs = [
        pl.BlockSpec((None, None, wp_full, cin_p),
                     (lambda bb, nn, hh, _r=r: (bb, hh * hstep + _r, 0, 0)))
        for r in range(win_h)
    ]
    # Weight/bias block index is constant along the innermost Ho axis ->
    # fetched once per (batch, N tile), held in VMEM across the row sweep.
    in_specs.append(pl.BlockSpec((kh * kw, cin_p, tn),
                                 lambda bb, nn, hh: (0, 0, nn)))
    in_specs.append(pl.BlockSpec((1, tn), lambda bb, nn, hh: (0, nn)))
    # Flattened (rows*cols, Cout) output: lane-dense 128..512-wide stores,
    # no in-kernel reshape.
    out_spec = pl.BlockSpec((None, th * wo_p, tn), lambda bb, nn, hh: (bb, hh, nn))

    out = pl.pallas_call(
        kern,
        out_shape=jax.ShapeDtypeStruct((B, ho_p * wo_p, cout_p), out_dtype),
        grid=(B, n_tiles, n_h),
        in_specs=in_specs,
        out_specs=out_spec,
        scratch_shapes=[pltpu.VMEM((th * wo_p, tn), jnp.float32)],
        compiler_params=pltpu.CompilerParams(
            dimension_semantics=("parallel", "parallel", "parallel"),
            vmem_limit_bytes=vmem_limit_bytes),
    )(*([xb] * win_h), w, b)

    # Crop grid/lane padding, back to the requested layout.
    out = out.reshape(B, ho_p, wo_p, cout_p)[:, :Ho, :Wo, :O]
    if channels_last:
        return out
    return jnp.transpose(out, (0, 3, 1, 2))


# --------------------------- pure-JAX reference -------------------------------

def equal_conv2d_ref(x_nchw, weight_oihw, bias=None, *, stride=1, padding=0,
                     lr_mul=1.0):
    O, I, kh, kw = weight_oihw.shape
    scale = lr_mul / math.sqrt(I * kh * kw)
    out = jax.lax.conv_general_dilated(
        x_nchw, weight_oihw * scale, (stride, stride),
        ((padding, padding), (padding, padding)),
        dimension_numbers=("NCHW", "OIHW", "NCHW"))
    if bias is not None:
        out = out + bias.reshape(1, -1, 1, 1)
    return out


# ---------------------------------- main --------------------------------------

if __name__ == "__main__":
    key = jax.random.PRNGKey(0)
    kx, kw3, kb3, kw1 = jax.random.split(key, 4)

    B, Cin, Cout, H, W, K = 2, 4, 8, 16, 16, 3
    x = jax.random.normal(kx, (B, Cin, H, W), jnp.float32)
    weight = jax.random.normal(kw3, (Cout, Cin, K, K), jnp.float32)
    bias = 0.1 * jax.random.normal(kb3, (Cout,), jnp.float32)

    # Case 1: 3x3, stride 1, padding 1, with bias (block_h=8, two H blocks).
    out1 = jax.block_until_ready(equal_conv2d(x, weight, bias, stride=1, padding=1))
    assert out1.shape == (B, Cout, H, W), out1.shape
    ref1 = equal_conv2d_ref(x, weight, bias, stride=1, padding=1)
    np.testing.assert_allclose(np.asarray(out1), np.asarray(ref1),
                               rtol=2e-2, atol=2e-2)

    # Case 2: 3x3, stride 2, padding 0, no bias (Wo=7 -> padded to 8, cropped).
    out2 = jax.block_until_ready(equal_conv2d(x, weight, None, stride=2, padding=0))
    assert out2.shape == (B, Cout, 7, 7), out2.shape
    ref2 = equal_conv2d_ref(x, weight, None, stride=2, padding=0)
    np.testing.assert_allclose(np.asarray(out2), np.asarray(ref2),
                               rtol=2e-2, atol=2e-2)

    # Case 3: 1x1 conv, bf16 output, channels_last I/O (no NCHW transposes).
    w1 = jax.random.normal(kw1, (16, Cin, 1, 1), jnp.float32)
    x_nhwc = jnp.transpose(x, (0, 2, 3, 1))
    out3 = jax.block_until_ready(
        equal_conv2d(x_nhwc, w1, None, stride=1, padding=0,
                     out_dtype=jnp.bfloat16, channels_last=True))
    assert out3.shape == (B, H, W, 16), out3.shape
    ref3 = jnp.transpose(equal_conv2d_ref(x, w1, None, stride=1, padding=0),
                         (0, 2, 3, 1))
    np.testing.assert_allclose(np.asarray(out3.astype(jnp.float32)),
                               np.asarray(ref3), rtol=3e-2, atol=3e-2)

    print("KERNEL_OK")
</pallas_src>

<mosaic_0001>
module attributes {stable_mosaic.version = 11 : i64} {
  func.func @_equal_conv2d_kernel(%arg0: i32, %arg1: i32, %arg2: i32, %arg3: memref<1x1x18x16xbf16, #tpu.memory_space<vmem>>, %arg4: memref<1x1x18x16xbf16, #tpu.memory_space<vmem>>, %arg5: memref<1x1x18x16xbf16, #tpu.memory_space<vmem>>, %arg6: memref<1x1x18x16xbf16, #tpu.memory_space<vmem>>, %arg7: memref<1x1x18x16xbf16, #tpu.memory_space<vmem>>, %arg8: memref<1x1x18x16xbf16, #tpu.memory_space<vmem>>, %arg9: memref<1x1x18x16xbf16, #tpu.memory_space<vmem>>, %arg10: memref<1x1x18x16xbf16, #tpu.memory_space<vmem>>, %arg11: memref<1x1x18x16xbf16, #tpu.memory_space<vmem>>, %arg12: memref<1x1x18x16xbf16, #tpu.memory_space<vmem>>, %arg13: memref<9x16x128xbf16, #tpu.memory_space<vmem>>, %arg14: memref<1x128xf32, #tpu.memory_space<vmem>>, %arg15: memref<1x128x128xf32, #tpu.memory_space<vmem>>, %arg16: memref<128x128xf32, #tpu.memory_space<vmem>>) attributes {dimension_semantics = [#tpu.dimension_semantics<parallel>, #tpu.dimension_semantics<parallel>, #tpu.dimension_semantics<parallel>], iteration_bounds = array<i64: 2, 1, 2>, scalar_prefetch = 0 : i64, scratch_operands = 1 : i64, tpu.core_type = #tpu.core_type<tc>, window_params = [{transform_indices = @transform_0, window_bounds = array<i64: 1, 1, 18, 16>}, {transform_indices = @transform_1, window_bounds = array<i64: 1, 1, 18, 16>}, {transform_indices = @transform_2, window_bounds = array<i64: 1, 1, 18, 16>}, {transform_indices = @transform_3, window_bounds = array<i64: 1, 1, 18, 16>}, {transform_indices = @transform_4, window_bounds = array<i64: 1, 1, 18, 16>}, {transform_indices = @transform_5, window_bounds = array<i64: 1, 1, 18, 16>}, {transform_indices = @transform_6, window_bounds = array<i64: 1, 1, 18, 16>}, {transform_indices = @transform_7, window_bounds = array<i64: 1, 1, 18, 16>}, {transform_indices = @transform_8, window_bounds = array<i64: 1, 1, 18, 16>}, {transform_indices = @transform_9, window_bounds = array<i64: 1, 1, 18, 16>}, {transform_indices = @transform_10, window_bounds = array<i64: 9, 16, 128>}, {transform_indices = @transform_11, window_bounds = array<i64: 1, 128>}, {transform_indices = @transform_12, window_bounds = array<i64: 1, 128, 128>}]} {
    %c0 = arith.constant 0 : index
    %c0_0 = arith.constant 0 : index
    %c0_1 = arith.constant 0 : index
    %c0_2 = arith.constant 0 : index
    %0 = vector.load %arg3[%c0, %c0_0, %c0_1, %c0_2] : memref<1x1x18x16xbf16, #tpu.memory_space<vmem>>, vector<1x1x16x16xbf16>
    %1 = vector.shape_cast %0 : vector<1x1x16x16xbf16> to vector<16x16xbf16>
    %c0_3 = arith.constant 0 : index
    %c0_4 = arith.constant 0 : index
    %c0_5 = arith.constant 0 : index
    %c0_6 = arith.constant 0 : index
    %2 = vector.load %arg4[%c0_3, %c0_4, %c0_5, %c0_6] : memref<1x1x18x16xbf16, #tpu.memory_space<vmem>>, vector<1x1x16x16xbf16>
    %3 = vector.shape_cast %2 : vector<1x1x16x16xbf16> to vector<16x16xbf16>
    %c0_7 = arith.constant 0 : index
    %c0_8 = arith.constant 0 : index
    %c0_9 = arith.constant 0 : index
    %c0_10 = arith.constant 0 : index
    %4 = vector.load %arg5[%c0_7, %c0_8, %c0_9, %c0_10] : memref<1x1x18x16xbf16, #tpu.memory_space<vmem>>, vector<1x1x16x16xbf16>
    %5 = vector.shape_cast %4 : vector<1x1x16x16xbf16> to vector<16x16xbf16>
    %c0_11 = arith.constant 0 : index
    %c0_12 = arith.constant 0 : index
    %c0_13 = arith.constant 0 : index
    %c0_14 = arith.constant 0 : index
    %6 = vector.load %arg6[%c0_11, %c0_12, %c0_13, %c0_14] : memref<1x1x18x16xbf16, #tpu.memory_space<vmem>>, vector<1x1x16x16xbf16>
    %7 = vector.shape_cast %6 : vector<1x1x16x16xbf16> to vector<16x16xbf16>
    %c0_15 = arith.constant 0 : index
    %c0_16 = arith.constant 0 : index
    %c0_17 = arith.constant 0 : index
    %c0_18 = arith.constant 0 : index
    %8 = vector.load %arg7[%c0_15, %c0_16, %c0_17, %c0_18] : memref<1x1x18x16xbf16, #tpu.memory_space<vmem>>, vector<1x1x16x16xbf16>
    %9 = vector.shape_cast %8 : vector<1x1x16x16xbf16> to vector<16x16xbf16>
    %c0_19 = arith.constant 0 : index
    %c0_20 = arith.constant 0 : index
    %c0_21 = arith.constant 0 : index
    %c0_22 = arith.constant 0 : index
    %10 = vector.load %arg8[%c0_19, %c0_20, %c0_21, %c0_22] : memref<1x1x18x16xbf16, #tpu.memory_space<vmem>>, vector<1x1x16x16xbf16>
    %11 = vector.shape_cast %10 : vector<1x1x16x16xbf16> to vector<16x16xbf16>
    %c0_23 = arith.constant 0 : index
    %c0_24 = arith.constant 0 : index
    %c0_25 = arith.constant 0 : index
    %c0_26 = arith.constant 0 : index
    %12 = vector.load %arg9[%c0_23, %c0_24, %c0_25, %c0_26] : memref<1x1x18x16xbf16, #tpu.memory_space<vmem>>, vector<1x1x16x16xbf16>
    %13 = vector.shape_cast %12 : vector<1x1x16x16xbf16> to vector<16x16xbf16>
    %c0_27 = arith.constant 0 : index
    %c0_28 = arith.constant 0 : index
    %c0_29 = arith.constant 0 : index
    %c0_30 = arith.constant 0 : index
    %14 = vector.load %arg10[%c0_27, %c0_28, %c0_29, %c0_30] : memref<1x1x18x16xbf16, #tpu.memory_space<vmem>>, vector<1x1x16x16xbf16>
    %15 = vector.shape_cast %14 : vector<1x1x16x16xbf16> to vector<16x16xbf16>
    %16 = tpu.concatenate %1, %3, %5, %7, %9, %11, %13, %15 in 0 : vector<16x16xbf16>, vector<16x16xbf16>, vector<16x16xbf16>, vector<16x16xbf16>, vector<16x16xbf16>, vector<16x16xbf16>, vector<16x16xbf16>, vector<16x16xbf16> -> vector<128x16xbf16>
    %c0_31 = arith.constant 0 : index
    %c0_32 = arith.constant 0 : index
    %c0_33 = arith.constant 0 : index
    %17 = vector.load %arg13[%c0_31, %c0_32, %c0_33] : memref<9x16x128xbf16, #tpu.memory_space<vmem>>, vector<1x16x128xbf16>
    %18 = vector.shape_cast %17 : vector<1x16x128xbf16> to vector<16x128xbf16>
    %cst = arith.constant dense<0.000000e+00> : vector<128x128xf32>
    %19 = tpu.matmul %16, %18, %cst {dimension_numbers = #tpu.dot_dimension_numbers<[1], [0], [0], [1], [0, 0, 1, 1], [], []>} : vector<128x16xbf16>, vector<16x128xbf16>, vector<128x128xf32> -> vector<128x128xf32>
    %c0_34 = arith.constant 0 : index
    %c0_35 = arith.constant 0 : index
    %20 = vector.load %arg16[%c0_34, %c0_35] : memref<128x128xf32, #tpu.memory_space<vmem>>, vector<128x128xf32>
    tpu.vector_store %arg16[%c0_34, %c0_35], %19 {strides = array<i32>} : memref<128x128xf32, #tpu.memory_space<vmem>>, vector<128x128xf32>,
    %c0_36 = arith.constant 0 : index
    %c0_37 = arith.constant 0 : index
    %c1 = arith.constant 1 : index
    %c0_38 = arith.constant 0 : index
    %21 = vector.load %arg3[%c0_36, %c0_37, %c1, %c0_38] : memref<1x1x18x16xbf16, #tpu.memory_space<vmem>>, vector<1x1x16x16xbf16>
    %22 = vector.shape_cast %21 : vector<1x1x16x16xbf16> to vector<16x16xbf16>
    %c0_39 = arith.constant 0 : index
    %c0_40 = arith.constant 0 : index
    %c1_41 = arith.constant 1 : index
    %c0_42 = arith.constant 0 : index
    %23 = vector.load %arg4[%c0_39, %c0_40, %c1_41, %c0_42] : memref<1x1x18x16xbf16, #tpu.memory_space<vmem>>, vector<1x1x16x16xbf16>
    %24 = vector.shape_cast %23 : vector<1x1x16x16xbf16> to vector<16x16xbf16>
    %c0_43 = arith.constant 0 : index
    %c0_44 = arith.constant 0 : index
    %c1_45 = arith.constant 1 : index
    %c0_46 = arith.constant 0 : index
    %25 = vector.load %arg5[%c0_43, %c0_44, %c1_45, %c0_46] : memref<1x1x18x16xbf16, #tpu.memory_space<vmem>>, vector<1x1x16x16xbf16>
    %26 = vector.shape_cast %25 : vector<1x1x16x16xbf16> to vector<16x16xbf16>
    %c0_47 = arith.constant 0 : index
    %c0_48 = arith.constant 0 : index
    %c1_49 = arith.constant 1 : index
    %c0_50 = arith.constant 0 : index
    %27 = vector.load %arg6[%c0_47, %c0_48, %c1_49, %c0_50] : memref<1x1x18x16xbf16, #tpu.memory_space<vmem>>, vector<1x1x16x16xbf16>
    %28 = vector.shape_cast %27 : vector<1x1x16x16xbf16> to vector<16x16xbf16>
    %c0_51 = arith.constant 0 : index
    %c0_52 = arith.constant 0 : index
    %c1_53 = arith.constant 1 : index
    %c0_54 = arith.constant 0 : index
    %29 = vector.load %arg7[%c0_51, %c0_52, %c1_53, %c0_54] : memref<1x1x18x16xbf16, #tpu.memory_space<vmem>>, vector<1x1x16x16xbf16>
    %30 = vector.shape_cast %29 : vector<1x1x16x16xbf16> to vector<16x16xbf16>
    %c0_55 = arith.constant 0 : index
    %c0_56 = arith.constant 0 : index
    %c1_57 = arith.constant 1 : index
    %c0_58 = arith.constant 0 : index
    %31 = vector.load %arg8[%c0_55, %c0_56, %c1_57, %c0_58] : memref<1x1x18x16xbf16, #tpu.memory_space<vmem>>, vector<1x1x16x16xbf16>
    %32 = vector.shape_cast %31 : vector<1x1x16x16xbf16> to vector<16x16xbf16>
    %c0_59 = arith.constant 0 : index
    %c0_60 = arith.constant 0 : index
    %c1_61 = arith.constant 1 : index
    %c0_62 = arith.constant 0 : index
    %33 = vector.load %arg9[%c0_59, %c0_60, %c1_61, %c0_62] : memref<1x1x18x16xbf16, #tpu.memory_space<vmem>>, vector<1x1x16x16xbf16>
    %34 = vector.shape_cast %33 : vector<1x1x16x16xbf16> to vector<16x16xbf16>
    %c0_63 = arith.constant 0 : index
    %c0_64 = arith.constant 0 : index
    %c1_65 = arith.constant 1 : index
    %c0_66 = arith.constant 0 : index
    %35 = vector.load %arg10[%c0_63, %c0_64, %c1_65, %c0_66] : memref<1x1x18x16xbf16, #tpu.memory_space<vmem>>, vector<1x1x16x16xbf16>
    %36 = vector.shape_cast %35 : vector<1x1x16x16xbf16> to vector<16x16xbf16>
    %37 = tpu.concatenate %22, %24, %26, %28, %30, %32, %34, %36 in 0 : vector<16x16xbf16>, vector<16x16xbf16>, vector<16x16xbf16>, vector<16x16xbf16>, vector<16x16xbf16>, vector<16x16xbf16>, vector<16x16xbf16>, vector<16x16xbf16> -> vector<128x16xbf16>
    %c1_67 = arith.constant 1 : index
    %c0_68 = arith.constant 0 : index
    %c0_69 = arith.constant 0 : index
    %38 = vector.load %arg13[%c1_67, %c0_68, %c0_69] : memref<9x16x128xbf16, #tpu.memory_space<vmem>>, vector<1x16x128xbf16>
    %39 = vector.shape_cast %38 : vector<1x16x128xbf16> to vector<16x128xbf16>
    %cst_70 = arith.constant dense<0.000000e+00> : vector<128x128xf32>
    %40 = tpu.matmul %37, %39, %cst_70 {dimension_numbers = #tpu.dot_dimension_numbers<[1], [0], [0], [1], [0, 0, 1, 1], [], []>} : vector<128x16xbf16>, vector<16x128xbf16>, vector<128x128xf32> -> vector<128x128xf32>
    %c0_71 = arith.constant 0 : index
    %c0_72 = arith.constant 0 : index
    %41 = vector.load %arg16[%c0_71, %c0_72] : memref<128x128xf32, #tpu.memory_space<vmem>>, vector<128x128xf32>
    %42 = arith.addf %41, %40 : vector<128x128xf32>
    %c0_73 = arith.constant 0 : index
    %c0_74 = arith.constant 0 : index
    %43 = vector.load %arg16[%c0_73, %c0_74] : memref<128x128xf32, #tpu.memory_space<vmem>>, vector<128x128xf32>
    tpu.vector_store %arg16[%c0_73, %c0_74], %42 {strides = array<i32>} : memref<128x128xf32, #tpu.memory_space<vmem>>, vector<128x128xf32>,
    %c0_75 = arith.constant 0 : index
    %c0_76 = arith.constant 0 : index
    %c2 = arith.constant 2 : index
    %c0_77 = arith.constant 0 : index
    %44 = vector.load %arg3[%c0_75, %c0_76, %c2, %c0_77] : memref<1x1x18x16xbf16, #tpu.memory_space<vmem>>, vector<1x1x16x16xbf16>
    %45 = vector.shape_cast %44 : vector<1x1x16x16xbf16> to vector<16x16xbf16>
    %c0_78 = arith.constant 0 : index
    %c0_79 = arith.constant 0 : index
    %c2_80 = arith.constant 2 : index
    %c0_81 = arith.constant 0 : index
    %46 = vector.load %arg4[%c0_78, %c0_79, %c2_80, %c0_81] : memref<1x1x18x16xbf16, #tpu.memory_space<vmem>>, vector<1x1x16x16xbf16>
    %47 = vector.shape_cast %46 : vector<1x1x16x16xbf16> to vector<16x16xbf16>
    %c0_82 = arith.constant 0 : index
    %c0_83 = arith.constant 0 : index
    %c2_84 = arith.constant 2 : index
    %c0_85 = arith.constant 0 : index
    %48 = vector.load %arg5[%c0_82, %c0_83, %c2_84, %c0_85] : memref<1x1x18x16xbf16, #tpu.memory_space<vmem>>, vector<1x1x16x16xbf16>
    %49 = vector.shape_cast %48 : vector<1x1x16x16xbf16> to vector<16x16xbf16>
    %c0_86 = arith.constant 0 : index
    %c0_87 = arith.constant 0 : index
    %c2_88 = arith.constant 2 : index
    %c0_89 = arith.constant 0 : index
    %50 = vector.load %arg6[%c0_86, %c0_87, %c2_88, %c0_89] : memref<1x1x18x16xbf16, #tpu.memory_space<vmem>>, vector<1x1x16x16xbf16>
    %51 = vector.shape_cast %50 : vector<1x1x16x16xbf16> to vector<16x16xbf16>
    %c0_90 = arith.constant 0 : index
    %c0_91 = arith.constant 0 : index
    %c2_92 = arith.constant 2 : index
    %c0_93 = arith.constant 0 : index
    %52 = vector.load %arg7[%c0_90, %c0_91, %c2_92, %c0_93] : memref<1x1x18x16xbf16, #tpu.memory_space<vmem>>, vector<1x1x16x16xbf16>
    %53 = vector.shape_cast %52 : vector<1x1x16x16xbf16> to vector<16x16xbf16>
    %c0_94 = arith.constant 0 : index
    %c0_95 = arith.constant 0 : index
    %c2_96 = arith.constant 2 : index
    %c0_97 = arith.constant 0 : index
    %54 = vector.load %arg8[%c0_94, %c0_95, %c2_96, %c0_97] : memref<1x1x18x16xbf16, #tpu.memory_space<vmem>>, vector<1x1x16x16xbf16>
    %55 = vector.shape_cast %54 : vector<1x1x16x16xbf16> to vector<16x16xbf16>
    %c0_98 = arith.constant 0 : index
    %c0_99 = arith.constant 0 : index
    %c2_100 = arith.constant 2 : index
    %c0_101 = arith.constant 0 : index
    %56 = vector.load %arg9[%c0_98, %c0_99, %c2_100, %c0_101] : memref<1x1x18x16xbf16, #tpu.memory_space<vmem>>, vector<1x1x16x16xbf16>
    %57 = vector.shape_cast %56 : vector<1x1x16x16xbf16> to vector<16x16xbf16>
    %c0_102 = arith.constant 0 : index
    %c0_103 = arith.constant 0 : index
    %c2_104 = arith.constant 2 : index
    %c0_105 = arith.constant 0 : index
    %58 = vector.load %arg10[%c0_102, %c0_103, %c2_104, %c0_105] : memref<1x1x18x16xbf16, #tpu.memory_space<vmem>>, vector<1x1x16x16xbf16>
    %59 = vector.shape_cast %58 : vector<1x1x16x16xbf16> to vector<16x16xbf16>
    %60 = tpu.concatenate %45, %47, %49, %51, %53, %55, %57, %59 in 0 : vector<16x16xbf16>, vector<16x16xbf16>, vector<16x16xbf16>, vector<16x16xbf16>, vector<16x16xbf16>, vector<16x16xbf16>, vector<16x16xbf16>, vector<16x16xbf16> -> vector<128x16xbf16>
    %c2_106 = arith.constant 2 : index
    %c0_107 = arith.constant 0 : index
    %c0_108 = arith.constant 0 : index
    %61 = vector.load %arg13[%c2_106, %c0_107, %c0_108] : memref<9x16x128xbf16, #tpu.memory_space<vmem>>, vector<1x16x128xbf16>
    %62 = vector.shape_cast %61 : vector<1x16x128xbf16> to vector<16x128xbf16>
    %cst_109 = arith.constant dense<0.000000e+00> : vector<128x128xf32>
    %63 = tpu.matmul %60, %62, %cst_109 {dimension_numbers = #tpu.dot_dimension_numbers<[1], [0], [0], [1], [0, 0, 1, 1], [], []>} : vector<128x16xbf16>, vector<16x128xbf16>, vector<128x128xf32> -> vector<128x128xf32>
    %c0_110 = arith.constant 0 : index
    %c0_111 = arith.constant 0 : index
    %64 = vector.load %arg16[%c0_110, %c0_111] : memref<128x128xf32, #tpu.memory_space<vmem>>, vector<128x128xf32>
    %65 = arith.addf %64, %63 : vector<128x128xf32>
    %c0_112 = arith.constant 0 : index
    %c0_113 = arith.constant 0 : index
    %66 = vector.load %arg16[%c0_112, %c0_113] : memref<128x128xf32, #tpu.memory_space<vmem>>, vector<128x128xf32>
    tpu.vector_store %arg16[%c0_112, %c0_113], %65 {strides = array<i32>} : memref<128x128xf32, #tpu.memory_space<vmem>>, vector<128x128xf32>,
    %c0_114 = arith.constant 0 : index
    %c0_115 = arith.constant 0 : index
    %c0_116 = arith.constant 0 : index
    %c0_117 = arith.constant 0 : index
    %67 = vector.load %arg4[%c0_114, %c0_115, %c0_116, %c0_117] : memref<1x1x18x16xbf16, #tpu.memory_space<vmem>>, vector<1x1x16x16xbf16>
    %68 = vector.shape_cast %67 : vector<1x1x16x16xbf16> to vector<16x16xbf16>
    %c0_118 = arith.constant 0 : index
    %c0_119 = arith.constant 0 : index
    %c0_120 = arith.constant 0 : index
    %c0_121 = arith.constant 0 : index
    %69 = vector.load %arg5[%c0_118, %c0_119, %c0_120, %c0_121] : memref<1x1x18x16xbf16, #tpu.memory_space<vmem>>, vector<1x1x16x16xbf16>
    %70 = vector.shape_cast %69 : vector<1x1x16x16xbf16> to vector<16x16xbf16>
    %c0_122 = arith.constant 0 : index
    %c0_123 = arith.constant 0 : index
    %c0_124 = arith.constant 0 : index
    %c0_125 = arith.constant 0 : index
    %71 = vector.load %arg6[%c0_122, %c0_123, %c0_124, %c0_125] : memref<1x1x18x16xbf16, #tpu.memory_space<vmem>>, vector<1x1x16x16xbf16>
    %72 = vector.shape_cast %71 : vector<1x1x16x16xbf16> to vector<16x16xbf16>
    %c0_126 = arith.constant 0 : index
    %c0_127 = arith.constant 0 : index
    %c0_128 = arith.constant 0 : index
    %c0_129 = arith.constant 0 : index
    %73 = vector.load %arg7[%c0_126, %c0_127, %c0_128, %c0_129] : memref<1x1x18x16xbf16, #tpu.memory_space<vmem>>, vector<1x1x16x16xbf16>
    %74 = vector.shape_cast %73 : vector<1x1x16x16xbf16> to vector<16x16xbf16>
    %c0_130 = arith.constant 0 : index
    %c0_131 = arith.constant 0 : index
    %c0_132 = arith.constant 0 : index
    %c0_133 = arith.constant 0 : index
    %75 = vector.load %arg8[%c0_130, %c0_131, %c0_132, %c0_133] : memref<1x1x18x16xbf16, #tpu.memory_space<vmem>>, vector<1x1x16x16xbf16>
    %76 = vector.shape_cast %75 : vector<1x1x16x16xbf16> to vector<16x16xbf16>
    %c0_134 = arith.constant 0 : index
    %c0_135 = arith.constant 0 : index
    %c0_136 = arith.constant 0 : index
    %c0_137 = arith.constant 0 : index
    %77 = vector.load %arg9[%c0_134, %c0_135, %c0_136, %c0_137] : memref<1x1x18x16xbf16, #tpu.memory_space<vmem>>, vector<1x1x16x16xbf16>
    %78 = vector.shape_cast %77 : vector<1x1x16x16xbf16> to vector<16x16xbf16>
    %c0_138 = arith.constant 0 : index
    %c0_139 = arith.constant 0 : index
    %c0_140 = arith.constant 0 : index
    %c0_141 = arith.constant 0 : index
    %79 = vector.load %arg10[%c0_138, %c0_139, %c0_140, %c0_141] : memref<1x1x18x16xbf16, #tpu.memory_space<vmem>>, vector<1x1x16x16xbf16>
    %80 = vector.shape_cast %79 : vector<1x1x16x16xbf16> to vector<16x16xbf16>
    %c0_142 = arith.constant 0 : index
    %c0_143 = arith.constant 0 : index
    %c0_144 = arith.constant 0 : index
    %c0_145 = arith.constant 0 : index
    %81 = vector.load %arg11[%c0_142, %c0_143, %c0_144, %c0_145] : memref<1x1x18x16xbf16, #tpu.memory_space<vmem>>, vector<1x1x16x16xbf16>
    %82 = vector.shape_cast %81 : vector<1x1x16x16xbf16> to vector<16x16xbf16>
    %83 = tpu.concatenate %68, %70, %72, %74, %76, %78, %80, %82 in 0 : vector<16x16xbf16>, vector<16x16xbf16>, vector<16x16xbf16>, vector<16x16xbf16>, vector<16x16xbf16>, vector<16x16xbf16>, vector<16x16xbf16>, vector<16x16xbf16> -> vector<128x16xbf16>
    %c3 = arith.constant 3 : index
    %c0_146 = arith.constant 0 : index
    %c0_147 = arith.constant 0 : index
    %84 = vector.load %arg13[%c3, %c0_146, %c0_147] : memref<9x16x128xbf16, #tpu.memory_space<vmem>>, vector<1x16x128xbf16>
    %85 = vector.shape_cast %84 : vector<1x16x128xbf16> to vector<16x128xbf16>
    %cst_148 = arith.constant dense<0.000000e+00> : vector<128x128xf32>
    %86 = tpu.matmul %83, %85, %cst_148 {dimension_numbers = #tpu.dot_dimension_numbers<[1], [0], [0], [1], [0, 0, 1, 1], [], []>} : vector<128x16xbf16>, vector<16x128xbf16>, vector<128x128xf32> -> vector<128x128xf32>
    %c0_149 = arith.constant 0 : index
    %c0_150 = arith.constant 0 : index
    %87 = vector.load %arg16[%c0_149, %c0_150] : memref<128x128xf32, #tpu.memory_space<vmem>>, vector<128x128xf32>
    %88 = arith.addf %87, %86 : vector<128x128xf32>
    %c0_151 = arith.constant 0 : index
    %c0_152 = arith.constant 0 : index
    %89 = vector.load %arg16[%c0_151, %c0_152] : memref<128x128xf32, #tpu.memory_space<vmem>>, vector<128x128xf32>
    tpu.vector_store %arg16[%c0_151, %c0_152], %88 {strides = array<i32>} : memref<128x128xf32, #tpu.memory_space<vmem>>, vector<128x128xf32>,
    %c0_153 = arith.constant 0 : index
    %c0_154 = arith.constant 0 : index
    %c1_155 = arith.constant 1 : index
    %c0_156 = arith.constant 0 : index
    %90 = vector.load %arg4[%c0_153, %c0_154, %c1_155, %c0_156] : memref<1x1x18x16xbf16, #tpu.memory_space<vmem>>, vector<1x1x16x16xbf16>
    %91 = vector.shape_cast %90 : vector<1x1x16x16xbf16> to vector<16x16xbf16>
    %c0_157 = arith.constant 0 : index
    %c0_158 = arith.constant 0 : index
    %c1_159 = arith.constant 1 : index
    %c0_160 = arith.constant 0 : index
    %92 = vector.load %arg5[%c0_157, %c0_158, %c1_159, %c0_160] : memref<1x1x18x16xbf16, #tpu.memory_space<vmem>>, vector<1x1x16x16xbf16>
    %93 = vector.shape_cast %92 : vector<1x1x16x16xbf16> to vector<16x16xbf16>
    %c0_161 = arith.constant 0 : index
    %c0_162 = arith.constant 0 : index
    %c1_163 = arith.constant 1 : index
    %c0_164 = arith.constant 0 : index
    %94 = vector.load %arg6[%c0_161, %c0_162, %c1_163, %c0_164] : memref<1x1x18x16xbf16, #tpu.memory_space<vmem>>, vector<1x1x16x16xbf16>
    %95 = vector.shape_cast %94 : vector<1x1x16x16xbf16> to vector<16x16xbf16>
    %c0_165 = arith.constant 0 : index
    %c0_166 = arith.constant 0 : index
    %c1_167 = arith.constant 1 : index
    %c0_168 = arith.constant 0 : index
    %96 = vector.load %arg7[%c0_165, %c0_166, %c1_167, %c0_168] : memref<1x1x18x16xbf16, #tpu.memory_space<vmem>>, vector<1x1x16x16xbf16>
    %97 = vector.shape_cast %96 : vector<1x1x16x16xbf16> to vector<16x16xbf16>
    %c0_169 = arith.constant 0 : index
    %c0_170 = arith.constant 0 : index
    %c1_171 = arith.constant 1 : index
    %c0_172 = arith.constant 0 : index
    %98 = vector.load %arg8[%c0_169, %c0_170, %c1_171, %c0_172] : memref<1x1x18x16xbf16, #tpu.memory_space<vmem>>, vector<1x1x16x16xbf16>
    %99 = vector.shape_cast %98 : vector<1x1x16x16xbf16> to vector<16x16xbf16>
    %c0_173 = arith.constant 0 : index
    %c0_174 = arith.constant 0 : index
    %c1_175 = arith.constant 1 : index
    %c0_176 = arith.constant 0 : index
    %100 = vector.load %arg9[%c0_173, %c0_174, %c1_175, %c0_176] : memref<1x1x18x16xbf16, #tpu.memory_space<vmem>>, vector<1x1x16x16xbf16>
    %101 = vector.shape_cast %100 : vector<1x1x16x16xbf16> to vector<16x16xbf16>
    %c0_177 = arith.constant 0 : index
    %c0_178 = arith.constant 0 : index
    %c1_179 = arith.constant 1 : index
    %c0_180 = arith.constant 0 : index
    %102 = vector.load %arg10[%c0_177, %c0_178, %c1_179, %c0_180] : memref<1x1x18x16xbf16, #tpu.memory_space<vmem>>, vector<1x1x16x16xbf16>
    %103 = vector.shape_cast %102 : vector<1x1x16x16xbf16> to vector<16x16xbf16>
    %c0_181 = arith.constant 0 : index
    %c0_182 = arith.constant 0 : index
    %c1_183 = arith.constant 1 : index
    %c0_184 = arith.constant 0 : index
    %104 = vector.load %arg11[%c0_181, %c0_182, %c1_183, %c0_184] : memref<1x1x18x16xbf16, #tpu.memory_space<vmem>>, vector<1x1x16x16xbf16>
    %105 = vector.shape_cast %104 : vector<1x1x16x16xbf16> to vector<16x16xbf16>
    %106 = tpu.concatenate %91, %93, %95, %97, %99, %101, %103, %105 in 0 : vector<16x16xbf16>, vector<16x16xbf16>, vector<16x16xbf16>, vector<16x16xbf16>, vector<16x16xbf16>, vector<16x16xbf16>, vector<16x16xbf16>, vector<16x16xbf16> -> vector<128x16xbf16>
    %c4 = arith.constant 4 : index
    %c0_185 = arith.constant 0 : index
    %c0_186 = arith.constant 0 : index
    %107 = vector.load %arg13[%c4, %c0_185, %c0_186] : memref<9x16x128xbf16, #tpu.memory_space<vmem>>, vector<1x16x128xbf16>
    %108 = vector.shape_cast %107 : vector<1x16x128xbf16> to vector<16x128xbf16>
    %cst_187 = arith.constant dense<0.000000e+00> : vector<128x128xf32>
    %109 = tpu.matmul %106, %108, %cst_187 {dimension_numbers = #tpu.dot_dimension_numbers<[1], [0], [0], [1], [0, 0, 1, 1], [], []>} : vector<128x16xbf16>, vector<16x128xbf16>, vector<128x128xf32> -> vector<128x128xf32>
    %c0_188 = arith.constant 0 : index
    %c0_189 = arith.constant 0 : index
    %110 = vector.load %arg16[%c0_188, %c0_189] : memref<128x128xf32, #tpu.memory_space<vmem>>, vector<128x128xf32>
    %111 = arith.addf %110, %109 : vector<128x128xf32>
    %c0_190 = arith.constant 0 : index
    %c0_191 = arith.constant 0 : index
    %112 = vector.load %arg16[%c0_190, %c0_191] : memref<128x128xf32, #tpu.memory_space<vmem>>, vector<128x128xf32>
    tpu.vector_store %arg16[%c0_190, %c0_191], %111 {strides = array<i32>} : memref<128x128xf32, #tpu.memory_space<vmem>>, vector<128x128xf32>,
    %c0_192 = arith.constant 0 : index
    %c0_193 = arith.constant 0 : index
    %c2_194 = arith.constant 2 : index
    %c0_195 = arith.constant 0 : index
    %113 = vector.load %arg4[%c0_192, %c0_193, %c2_194, %c0_195] : memref<1x1x18x16xbf16, #tpu.memory_space<vmem>>, vector<1x1x16x16xbf16>
    %114 = vector.shape_cast %113 : vector<1x1x16x16xbf16> to vector<16x16xbf16>
    %c0_196 = arith.constant 0 : index
    %c0_197 = arith.constant 0 : index
    %c2_198 = arith.constant 2 : index
    %c0_199 = arith.constant 0 : index
    %115 = vector.load %arg5[%c0_196, %c0_197, %c2_198, %c0_199] : memref<1x1x18x16xbf16, #tpu.memory_space<vmem>>, vector<1x1x16x16xbf16>
    %116 = vector.shape_cast %115 : vector<1x1x16x16xbf16> to vector<16x16xbf16>
    %c0_200 = arith.constant 0 : index
    %c0_201 = arith.constant 0 : index
    %c2_202 = arith.constant 2 : index
    %c0_203 = arith.constant 0 : index
    %117 = vector.load %arg6[%c0_200, %c0_201, %c2_202, %c0_203] : memref<1x1x18x16xbf16, #tpu.memory_space<vmem>>, vector<1x1x16x16xbf16>
    %118 = vector.shape_cast %117 : vector<1x1x16x16xbf16> to vector<16x16xbf16>
    %c0_204 = arith.constant 0 : index
    %c0_205 = arith.constant 0 : index
    %c2_206 = arith.constant 2 : index
    %c0_207 = arith.constant 0 : index
    %119 = vector.load %arg7[%c0_204, %c0_205, %c2_206, %c0_207] : memref<1x1x18x16xbf16, #tpu.memory_space<vmem>>, vector<1x1x16x16xbf16>
    %120 = vector.shape_cast %119 : vector<1x1x16x16xbf16> to vector<16x16xbf16>
    %c0_208 = arith.constant 0 : index
    %c0_209 = arith.constant 0 : index
    %c2_210 = arith.constant 2 : index
    %c0_211 = arith.constant 0 : index
    %121 = vector.load %arg8[%c0_208, %c0_209, %c2_210, %c0_211] : memref<1x1x18x16xbf16, #tpu.memory_space<vmem>>, vector<1x1x16x16xbf16>
    %122 = vector.shape_cast %121 : vector<1x1x16x16xbf16> to vector<16x16xbf16>
    %c0_212 = arith.constant 0 : index
    %c0_213 = arith.constant 0 : index
    %c2_214 = arith.constant 2 : index
    %c0_215 = arith.constant 0 : index
    %123 = vector.load %arg9[%c0_212, %c0_213, %c2_214, %c0_215] : memref<1x1x18x16xbf16, #tpu.memory_space<vmem>>, vector<1x1x16x16xbf16>
    %124 = vector.shape_cast %123 : vector<1x1x16x16xbf16> to vector<16x16xbf16>
    %c0_216 = arith.constant 0 : index
    %c0_217 = arith.constant 0 : index
    %c2_218 = arith.constant 2 : index
    %c0_219 = arith.constant 0 : index
    %125 = vector.load %arg10[%c0_216, %c0_217, %c2_218, %c0_219] : memref<1x1x18x16xbf16, #tpu.memory_space<vmem>>, vector<1x1x16x16xbf16>
    %126 = vector.shape_cast %125 : vector<1x1x16x16xbf16> to vector<16x16xbf16>
    %c0_220 = arith.constant 0 : index
    %c0_221 = arith.constant 0 : index
    %c2_222 = arith.constant 2 : index
    %c0_223 = arith.constant 0 : index
    %127 = vector.load %arg11[%c0_220, %c0_221, %c2_222, %c0_223] : memref<1x1x18x16xbf16, #tpu.memory_space<vmem>>, vector<1x1x16x16xbf16>
    %128 = vector.shape_cast %127 : vector<1x1x16x16xbf16> to vector<16x16xbf16>
    %129 = tpu.concatenate %114, %116, %118, %120, %122, %124, %126, %128 in 0 : vector<16x16xbf16>, vector<16x16xbf16>, vector<16x16xbf16>, vector<16x16xbf16>, vector<16x16xbf16>, vector<16x16xbf16>, vector<16x16xbf16>, vector<16x16xbf16> -> vector<128x16xbf16>
    %c5 = arith.constant 5 : index
    %c0_224 = arith.constant 0 : index
    %c0_225 = arith.constant 0 : index
    %130 = vector.load %arg13[%c5, %c0_224, %c0_225] : memref<9x16x128xbf16, #tpu.memory_space<vmem>>, vector<1x16x128xbf16>
    %131 = vector.shape_cast %130 : vector<1x16x128xbf16> to vector<16x128xbf16>
    %cst_226 = arith.constant dense<0.000000e+00> : vector<128x128xf32>
    %132 = tpu.matmul %129, %131, %cst_226 {dimension_numbers = #tpu.dot_dimension_numbers<[1], [0], [0], [1], [0, 0, 1, 1], [], []>} : vector<128x16xbf16>, vector<16x128xbf16>, vector<128x128xf32> -> vector<128x128xf32>
    %c0_227 = arith.constant 0 : index
    %c0_228 = arith.constant 0 : index
    %133 = vector.load %arg16[%c0_227, %c0_228] : memref<128x128xf32, #tpu.memory_space<vmem>>, vector<128x128xf32>
    %134 = arith.addf %133, %132 : vector<128x128xf32>
    %c0_229 = arith.constant 0 : index
    %c0_230 = arith.constant 0 : index
    %135 = vector.load %arg16[%c0_229, %c0_230] : memref<128x128xf32, #tpu.memory_space<vmem>>, vector<128x128xf32>
    tpu.vector_store %arg16[%c0_229, %c0_230], %134 {strides = array<i32>} : memref<128x128xf32, #tpu.memory_space<vmem>>, vector<128x128xf32>,
    %c0_231 = arith.constant 0 : index
    %c0_232 = arith.constant 0 : index
    %c0_233 = arith.constant 0 : index
    %c0_234 = arith.constant 0 : index
    %136 = vector.load %arg5[%c0_231, %c0_232, %c0_233, %c0_234] : memref<1x1x18x16xbf16, #tpu.memory_space<vmem>>, vector<1x1x16x16xbf16>
    %137 = vector.shape_cast %136 : vector<1x1x16x16xbf16> to vector<16x16xbf16>
    %c0_235 = arith.constant 0 : index
    %c0_236 = arith.constant 0 : index
    %c0_237 = arith.constant 0 : index
    %c0_238 = arith.constant 0 : index
    %138 = vector.load %arg6[%c0_235, %c0_236, %c0_237, %c0_238] : memref<1x1x18x16xbf16, #tpu.memory_space<vmem>>, vector<1x1x16x16xbf16>
    %139 = vector.shape_cast %138 : vector<1x1x16x16xbf16> to vector<16x16xbf16>
    %c0_239 = arith.constant 0 : index
    %c0_240 = arith.constant 0 : index
    %c0_241 = arith.constant 0 : index
    %c0_242 = arith.constant 0 : index
    %140 = vector.load %arg7[%c0_239, %c0_240, %c0_241, %c0_242] : memref<1x1x18x16xbf16, #tpu.memory_space<vmem>>, vector<1x1x16x16xbf16>
    %141 = vector.shape_cast %140 : vector<1x1x16x16xbf16> to vector<16x16xbf16>
    %c0_243 = arith.constant 0 : index
    %c0_244 = arith.constant 0 : index
    %c0_245 = arith.constant 0 : index
    %c0_246 = arith.constant 0 : index
    %142 = vector.load %arg8[%c0_243, %c0_244, %c0_245, %c0_246] : memref<1x1x18x16xbf16, #tpu.memory_space<vmem>>, vector<1x1x16x16xbf16>
    %143 = vector.shape_cast %142 : vector<1x1x16x16xbf16> to vector<16x16xbf16>
    %c0_247 = arith.constant 0 : index
    %c0_248 = arith.constant 0 : index
    %c0_249 = arith.constant 0 : index
    %c0_250 = arith.constant 0 : index
    %144 = vector.load %arg9[%c0_247, %c0_248, %c0_249, %c0_250] : memref<1x1x18x16xbf16, #tpu.memory_space<vmem>>, vector<1x1x16x16xbf16>
    %145 = vector.shape_cast %144 : vector<1x1x16x16xbf16> to vector<16x16xbf16>
    %c0_251 = arith.constant 0 : index
    %c0_252 = arith.constant 0 : index
    %c0_253 = arith.constant 0 : index
    %c0_254 = arith.constant 0 : index
    %146 = vector.load %arg10[%c0_251, %c0_252, %c0_253, %c0_254] : memref<1x1x18x16xbf16, #tpu.memory_space<vmem>>, vector<1x1x16x16xbf16>
    %147 = vector.shape_cast %146 : vector<1x1x16x16xbf16> to vector<16x16xbf16>
    %c0_255 = arith.constant 0 : index
    %c0_256 = arith.constant 0 : index
    %c0_257 = arith.constant 0 : index
    %c0_258 = arith.constant 0 : index
    %148 = vector.load %arg11[%c0_255, %c0_256, %c0_257, %c0_258] : memref<1x1x18x16xbf16, #tpu.memory_space<vmem>>, vector<1x1x16x16xbf16>
    %149 = vector.shape_cast %148 : vector<1x1x16x16xbf16> to vector<16x16xbf16>
    %c0_259 = arith.constant 0 : index
    %c0_260 = arith.constant 0 : index
    %c0_261 = arith.constant 0 : index
    %c0_262 = arith.constant 0 : index
    %150 = vector.load %arg12[%c0_259, %c0_260, %c0_261, %c0_262] : memref<1x1x18x16xbf16, #tpu.memory_space<vmem>>, vector<1x1x16x16xbf16>
    %151 = vector.shape_cast %150 : vector<1x1x16x16xbf16> to vector<16x16xbf16>
    %152 = tpu.concatenate %137, %139, %141, %143, %145, %147, %149, %151 in 0 : vector<16x16xbf16>, vector<16x16xbf16>, vector<16x16xbf16>, vector<16x16xbf16>, vector<16x16xbf16>, vector<16x16xbf16>, vector<16x16xbf16>, vector<16x16xbf16> -> vector<128x16xbf16>
    %c6 = arith.constant 6 : index
    %c0_263 = arith.constant 0 : index
    %c0_264 = arith.constant 0 : index
    %153 = vector.load %arg13[%c6, %c0_263, %c0_264] : memref<9x16x128xbf16, #tpu.memory_space<vmem>>, vector<1x16x128xbf16>
    %154 = vector.shape_cast %153 : vector<1x16x128xbf16> to vector<16x128xbf16>
    %cst_265 = arith.constant dense<0.000000e+00> : vector<128x128xf32>
    %155 = tpu.matmul %152, %154, %cst_265 {dimension_numbers = #tpu.dot_dimension_numbers<[1], [0], [0], [1], [0, 0, 1, 1], [], []>} : vector<128x16xbf16>, vector<16x128xbf16>, vector<128x128xf32> -> vector<128x128xf32>
    %c0_266 = arith.constant 0 : index
    %c0_267 = arith.constant 0 : index
    %156 = vector.load %arg16[%c0_266, %c0_267] : memref<128x128xf32, #tpu.memory_space<vmem>>, vector<128x128xf32>
    %157 = arith.addf %156, %155 : vector<128x128xf32>
    %c0_268 = arith.constant 0 : index
    %c0_269 = arith.constant 0 : index
    %158 = vector.load %arg16[%c0_268, %c0_269] : memref<128x128xf32, #tpu.memory_space<vmem>>, vector<128x128xf32>
    tpu.vector_store %arg16[%c0_268, %c0_269], %157 {strides = array<i32>} : memref<128x128xf32, #tpu.memory_space<vmem>>, vector<128x128xf32>,
    %c0_270 = arith.constant 0 : index
    %c0_271 = arith.constant 0 : index
    %c1_272 = arith.constant 1 : index
    %c0_273 = arith.constant 0 : index
    %159 = vector.load %arg5[%c0_270, %c0_271, %c1_272, %c0_273] : memref<1x1x18x16xbf16, #tpu.memory_space<vmem>>, vector<1x1x16x16xbf16>
    %160 = vector.shape_cast %159 : vector<1x1x16x16xbf16> to vector<16x16xbf16>
    %c0_274 = arith.constant 0 : index
    %c0_275 = arith.constant 0 : index
    %c1_276 = arith.constant 1 : index
    %c0_277 = arith.constant 0 : index
    %161 = vector.load %arg6[%c0_274, %c0_275, %c1_276, %c0_277] : memref<1x1x18x16xbf16, #tpu.memory_space<vmem>>, vector<1x1x16x16xbf16>
    %162 = vector.shape_cast %161 : vector<1x1x16x16xbf16> to vector<16x16xbf16>
    %c0_278 = arith.constant 0 : index
    %c0_279 = arith.constant 0 : index
    %c1_280 = arith.constant 1 : index
    %c0_281 = arith.constant 0 : index
    %163 = vector.load %arg7[%c0_278, %c0_279, %c1_280, %c0_281] : memref<1x1x18x16xbf16, #tpu.memory_space<vmem>>, vector<1x1x16x16xbf16>
    %164 = vector.shape_cast %163 : vector<1x1x16x16xbf16> to vector<16x16xbf16>
    %c0_282 = arith.constant 0 : index
    %c0_283 = arith.constant 0 : index
    %c1_284 = arith.constant 1 : index
    %c0_285 = arith.constant 0 : index
    %165 = vector.load %arg8[%c0_282, %c0_283, %c1_284, %c0_285] : memref<1x1x18x16xbf16, #tpu.memory_space<vmem>>, vector<1x1x16x16xbf16>
    %166 = vector.shape_cast %165 : vector<1x1x16x16xbf16> to vector<16x16xbf16>
    %c0_286 = arith.constant 0 : index
    %c0_287 = arith.constant 0 : index
    %c1_288 = arith.constant 1 : index
    %c0_289 = arith.constant 0 : index
    %167 = vector.load %arg9[%c0_286, %c0_287, %c1_288, %c0_289] : memref<1x1x18x16xbf16, #tpu.memory_space<vmem>>, vector<1x1x16x16xbf16>
    %168 = vector.shape_cast %167 : vector<1x1x16x16xbf16> to vector<16x16xbf16>
    %c0_290 = arith.constant 0 : index
    %c0_291 = arith.constant 0 : index
    %c1_292 = arith.constant 1 : index
    %c0_293 = arith.constant 0 : index
    %169 = vector.load %arg10[%c0_290, %c0_291, %c1_292, %c0_293] : memref<1x1x18x16xbf16, #tpu.memory_space<vmem>>, vector<1x1x16x16xbf16>
    %170 = vector.shape_cast %169 : vector<1x1x16x16xbf16> to vector<16x16xbf16>
    %c0_294 = arith.constant 0 : index
    %c0_295 = arith.constant 0 : index
    %c1_296 = arith.constant 1 : index
    %c0_297 = arith.constant 0 : index
    %171 = vector.load %arg11[%c0_294, %c0_295, %c1_296, %c0_297] : memref<1x1x18x16xbf16, #tpu.memory_space<vmem>>, vector<1x1x16x16xbf16>
    %172 = vector.shape_cast %171 : vector<1x1x16x16xbf16> to vector<16x16xbf16>
    %c0_298 = arith.constant 0 : index
    %c0_299 = arith.constant 0 : index
    %c1_300 = arith.constant 1 : index
    %c0_301 = arith.constant 0 : index
    %173 = vector.load %arg12[%c0_298, %c0_299, %c1_300, %c0_301] : memref<1x1x18x16xbf16, #tpu.memory_space<vmem>>, vector<1x1x16x16xbf16>
    %174 = vector.shape_cast %173 : vector<1x1x16x16xbf16> to vector<16x16xbf16>
    %175 = tpu.concatenate %160, %162, %164, %166, %168, %170, %172, %174 in 0 : vector<16x16xbf16>, vector<16x16xbf16>, vector<16x16xbf16>, vector<16x16xbf16>, vector<16x16xbf16>, vector<16x16xbf16>, vector<16x16xbf16>, vector<16x16xbf16> -> vector<128x16xbf16>
    %c7 = arith.constant 7 : index
    %c0_302 = arith.constant 0 : index
    %c0_303 = arith.constant 0 : index
    %176 = vector.load %arg13[%c7, %c0_302, %c0_303] : memref<9x16x128xbf16, #tpu.memory_space<vmem>>, vector<1x16x128xbf16>
    %177 = vector.shape_cast %176 : vector<1x16x128xbf16> to vector<16x128xbf16>
    %cst_304 = arith.constant dense<0.000000e+00> : vector<128x128xf32>
    %178 = tpu.matmul %175, %177, %cst_304 {dimension_numbers = #tpu.dot_dimension_numbers<[1], [0], [0], [1], [0, 0, 1, 1], [], []>} : vector<128x16xbf16>, vector<16x128xbf16>, vector<128x128xf32> -> vector<128x128xf32>
    %c0_305 = arith.constant 0 : index
    %c0_306 = arith.constant 0 : index
    %179 = vector.load %arg16[%c0_305, %c0_306] : memref<128x128xf32, #tpu.memory_space<vmem>>, vector<128x128xf32>
    %180 = arith.addf %179, %178 : vector<128x128xf32>
    %c0_307 = arith.constant 0 : index
    %c0_308 = arith.constant 0 : index
    %181 = vector.load %arg16[%c0_307, %c0_308] : memref<128x128xf32, #tpu.memory_space<vmem>>, vector<128x128xf32>
    tpu.vector_store %arg16[%c0_307, %c0_308], %180 {strides = array<i32>} : memref<128x128xf32, #tpu.memory_space<vmem>>, vector<128x128xf32>,
    %c0_309 = arith.constant 0 : index
    %c0_310 = arith.constant 0 : index
    %c2_311 = arith.constant 2 : index
    %c0_312 = arith.constant 0 : index
    %182 = vector.load %arg5[%c0_309, %c0_310, %c2_311, %c0_312] : memref<1x1x18x16xbf16, #tpu.memory_space<vmem>>, vector<1x1x16x16xbf16>
    %183 = vector.shape_cast %182 : vector<1x1x16x16xbf16> to vector<16x16xbf16>
    %c0_313 = arith.constant 0 : index
    %c0_314 = arith.constant 0 : index
    %c2_315 = arith.constant 2 : index
    %c0_316 = arith.constant 0 : index
    %184 = vector.load %arg6[%c0_313, %c0_314, %c2_315, %c0_316] : memref<1x1x18x16xbf16, #tpu.memory_space<vmem>>, vector<1x1x16x16xbf16>
    %185 = vector.shape_cast %184 : vector<1x1x16x16xbf16> to vector<16x16xbf16>
    %c0_317 = arith.constant 0 : index
    %c0_318 = arith.constant 0 : index
    %c2_319 = arith.constant 2 : index
    %c0_320 = arith.constant 0 : index
    %186 = vector.load %arg7[%c0_317, %c0_318, %c2_319, %c0_320] : memref<1x1x18x16xbf16, #tpu.memory_space<vmem>>, vector<1x1x16x16xbf16>
    %187 = vector.shape_cast %186 : vector<1x1x16x16xbf16> to vector<16x16xbf16>
    %c0_321 = arith.constant 0 : index
    %c0_322 = arith.constant 0 : index
    %c2_323 = arith.constant 2 : index
    %c0_324 = arith.constant 0 : index
    %188 = vector.load %arg8[%c0_321, %c0_322, %c2_323, %c0_324] : memref<1x1x18x16xbf16, #tpu.memory_space<vmem>>, vector<1x1x16x16xbf16>
    %189 = vector.shape_cast %188 : vector<1x1x16x16xbf16> to vector<16x16xbf16>
    %c0_325 = arith.constant 0 : index
    %c0_326 = arith.constant 0 : index
    %c2_327 = arith.constant 2 : index
    %c0_328 = arith.constant 0 : index
    %190 = vector.load %arg9[%c0_325, %c0_326, %c2_327, %c0_328] : memref<1x1x18x16xbf16, #tpu.memory_space<vmem>>, vector<1x1x16x16xbf16>
    %191 = vector.shape_cast %190 : vector<1x1x16x16xbf16> to vector<16x16xbf16>
    %c0_329 = arith.constant 0 : index
    %c0_330 = arith.constant 0 : index
    %c2_331 = arith.constant 2 : index
    %c0_332 = arith.constant 0 : index
    %192 = vector.load %arg10[%c0_329, %c0_330, %c2_331, %c0_332] : memref<1x1x18x16xbf16, #tpu.memory_space<vmem>>, vector<1x1x16x16xbf16>
    %193 = vector.shape_cast %192 : vector<1x1x16x16xbf16> to vector<16x16xbf16>
    %c0_333 = arith.constant 0 : index
    %c0_334 = arith.constant 0 : index
    %c2_335 = arith.constant 2 : index
    %c0_336 = arith.constant 0 : index
    %194 = vector.load %arg11[%c0_333, %c0_334, %c2_335, %c0_336] : memref<1x1x18x16xbf16, #tpu.memory_space<vmem>>, vector<1x1x16x16xbf16>
    %195 = vector.shape_cast %194 : vector<1x1x16x16xbf16> to vector<16x16xbf16>
    %c0_337 = arith.constant 0 : index
    %c0_338 = arith.constant 0 : index
    %c2_339 = arith.constant 2 : index
    %c0_340 = arith.constant 0 : index
    %196 = vector.load %arg12[%c0_337, %c0_338, %c2_339, %c0_340] : memref<1x1x18x16xbf16, #tpu.memory_space<vmem>>, vector<1x1x16x16xbf16>
    %197 = vector.shape_cast %196 : vector<1x1x16x16xbf16> to vector<16x16xbf16>
    %198 = tpu.concatenate %183, %185, %187, %189, %191, %193, %195, %197 in 0 : vector<16x16xbf16>, vector<16x16xbf16>, vector<16x16xbf16>, vector<16x16xbf16>, vector<16x16xbf16>, vector<16x16xbf16>, vector<16x16xbf16>, vector<16x16xbf16> -> vector<128x16xbf16>
    %c8 = arith.constant 8 : index
    %c0_341 = arith.constant 0 : index
    %c0_342 = arith.constant 0 : index
    %199 = vector.load %arg13[%c8, %c0_341, %c0_342] : memref<9x16x128xbf16, #tpu.memory_space<vmem>>, vector<1x16x128xbf16>
    %200 = vector.shape_cast %199 : vector<1x16x128xbf16> to vector<16x128xbf16>
    %cst_343 = arith.constant dense<0.000000e+00> : vector<128x128xf32>
    %201 = tpu.matmul %198, %200, %cst_343 {dimension_numbers = #tpu.dot_dimension_numbers<[1], [0], [0], [1], [0, 0, 1, 1], [], []>} : vector<128x16xbf16>, vector<16x128xbf16>, vector<128x128xf32> -> vector<128x128xf32>
    %c0_344 = arith.constant 0 : index
    %c0_345 = arith.constant 0 : index
    %202 = vector.load %arg16[%c0_344, %c0_345] : memref<128x128xf32, #tpu.memory_space<vmem>>, vector<128x128xf32>
    %203 = arith.addf %202, %201 : vector<128x128xf32>
    %c0_346 = arith.constant 0 : index
    %c0_347 = arith.constant 0 : index
    %204 = vector.load %arg16[%c0_346, %c0_347] : memref<128x128xf32, #tpu.memory_space<vmem>>, vector<128x128xf32>
    tpu.vector_store %arg16[%c0_346, %c0_347], %203 {strides = array<i32>} : memref<128x128xf32, #tpu.memory_space<vmem>>, vector<128x128xf32>,
    %c0_348 = arith.constant 0 : index
    %c0_349 = arith.constant 0 : index
    %205 = vector.load %arg16[%c0_348, %c0_349] : memref<128x128xf32, #tpu.memory_space<vmem>>, vector<128x128xf32>
    %c0_350 = arith.constant 0 : index
    %c0_351 = arith.constant 0 : index
    %206 = vector.load %arg14[%c0_350, %c0_351] : memref<1x128xf32, #tpu.memory_space<vmem>>, vector<1x128xf32>
    %207 = vector.broadcast %206 : vector<1x128xf32> to vector<128x128xf32>
    %208 = arith.addf %205, %207 : vector<128x128xf32>
    %c0_352 = arith.constant 0 : index
    %c0_353 = arith.constant 0 : index
    %c0_354 = arith.constant 0 : index
    %209 = vector.load %arg15[%c0_352, %c0_353, %c0_354] : memref<1x128x128xf32, #tpu.memory_space<vmem>>, vector<1x128x128xf32>
    %210 = vector.shape_cast %209 : vector<1x128x128xf32> to vector<128x128xf32>
    %211 = vector.shape_cast %208 : vector<128x128xf32> to vector<1x128x128xf32>
    tpu.vector_store %arg15[%c0_352, %c0_353, %c0_354], %211 {strides = array<i32>} : memref<1x128x128xf32, #tpu.memory_space<vmem>>, vector<1x128x128xf32>,
    return
  }
  func.func @transform_0(%arg0: i32, %arg1: i32, %arg2: i32) -> (i32, i32, i32, i32) {
    %c8_i32 = arith.constant 8 : i32
    %0 = arith.muli %arg2, %c8_i32 : i32
    %c0_i32 = arith.constant 0 : i32
    %1 = arith.addi %0, %c0_i32 : i32
    %c0_i32_0 = arith.constant 0 : i32
    %c0_i32_1 = arith.constant 0 : i32
    %c0_i32_2 = arith.constant 0 : i32
    return %arg0, %1, %c0_i32_0, %c0_i32_1 : i32, i32, i32, i32
  }
  func.func @transform_1(%arg0: i32, %arg1: i32, %arg2: i32) -> (i32, i32, i32, i32) {
    %c8_i32 = arith.constant 8 : i32
    %0 = arith.muli %arg2, %c8_i32 : i32
    %c1_i32 = arith.constant 1 : i32
    %1 = arith.addi %0, %c1_i32 : i32
    %c0_i32 = arith.constant 0 : i32
    %c0_i32_0 = arith.constant 0 : i32
    %c0_i32_1 = arith.constant 0 : i32
    return %arg0, %1, %c0_i32, %c0_i32_0 : i32, i32, i32, i32
  }
  func.func @transform_2(%arg0: i32, %arg1: i32, %arg2: i32) -> (i32, i32, i32, i32) {
    %c8_i32 = arith.constant 8 : i32
    %0 = arith.muli %arg2, %c8_i32 : i32
    %c2_i32 = arith.constant 2 : i32
    %1 = arith.addi %0, %c2_i32 : i32
    %c0_i32 = arith.constant 0 : i32
    %c0_i32_0 = arith.constant 0 : i32
    %c0_i32_1 = arith.constant 0 : i32
    return %arg0, %1, %c0_i32, %c0_i32_0 : i32, i32, i32, i32
  }
  func.func @transform_3(%arg0: i32, %arg1: i32, %arg2: i32) -> (i32, i32, i32, i32) {
    %c8_i32 = arith.constant 8 : i32
    %0 = arith.muli %arg2, %c8_i32 : i32
    %c3_i32 = arith.constant 3 : i32
    %1 = arith.addi %0, %c3_i32 : i32
    %c0_i32 = arith.constant 0 : i32
    %c0_i32_0 = arith.constant 0 : i32
    %c0_i32_1 = arith.constant 0 : i32
    return %arg0, %1, %c0_i32, %c0_i32_0 : i32, i32, i32, i32
  }
  func.func @transform_4(%arg0: i32, %arg1: i32, %arg2: i32) -> (i32, i32, i32, i32) {
    %c8_i32 = arith.constant 8 : i32
    %0 = arith.muli %arg2, %c8_i32 : i32
    %c4_i32 = arith.constant 4 : i32
    %1 = arith.addi %0, %c4_i32 : i32
    %c0_i32 = arith.constant 0 : i32
    %c0_i32_0 = arith.constant 0 : i32
    %c0_i32_1 = arith.constant 0 : i32
    return %arg0, %1, %c0_i32, %c0_i32_0 : i32, i32, i32, i32
  }
  func.func @transform_5(%arg0: i32, %arg1: i32, %arg2: i32) -> (i32, i32, i32, i32) {
    %c8_i32 = arith.constant 8 : i32
    %0 = arith.muli %arg2, %c8_i32 : i32
    %c5_i32 = arith.constant 5 : i32
    %1 = arith.addi %0, %c5_i32 : i32
    %c0_i32 = arith.constant 0 : i32
    %c0_i32_0 = arith.constant 0 : i32
    %c0_i32_1 = arith.constant 0 : i32
    return %arg0, %1, %c0_i32, %c0_i32_0 : i32, i32, i32, i32
  }
  func.func @transform_6(%arg0: i32, %arg1: i32, %arg2: i32) -> (i32, i32, i32, i32) {
    %c8_i32 = arith.constant 8 : i32
    %0 = arith.muli %arg2, %c8_i32 : i32
    %c6_i32 = arith.constant 6 : i32
    %1 = arith.addi %0, %c6_i32 : i32
    %c0_i32 = arith.constant 0 : i32
    %c0_i32_0 = arith.constant 0 : i32
    %c0_i32_1 = arith.constant 0 : i32
    return %arg0, %1, %c0_i32, %c0_i32_0 : i32, i32, i32, i32
  }
  func.func @transform_7(%arg0: i32, %arg1: i32, %arg2: i32) -> (i32, i32, i32, i32) {
    %c8_i32 = arith.constant 8 : i32
    %0 = arith.muli %arg2, %c8_i32 : i32
    %c7_i32 = arith.constant 7 : i32
    %1 = arith.addi %0, %c7_i32 : i32
    %c0_i32 = arith.constant 0 : i32
    %c0_i32_0 = arith.constant 0 : i32
    %c0_i32_1 = arith.constant 0 : i32
    return %arg0, %1, %c0_i32, %c0_i32_0 : i32, i32, i32, i32
  }
  func.func @transform_8(%arg0: i32, %arg1: i32, %arg2: i32) -> (i32, i32, i32, i32) {
    %c8_i32 = arith.constant 8 : i32
    %0 = arith.muli %arg2, %c8_i32 : i32
    %c8_i32_0 = arith.constant 8 : i32
    %1 = arith.addi %0, %c8_i32_0 : i32
    %c0_i32 = arith.constant 0 : i32
    %c0_i32_1 = arith.constant 0 : i32
    %c0_i32_2 = arith.constant 0 : i32
    return %arg0, %1, %c0_i32, %c0_i32_1 : i32, i32, i32, i32
  }
  func.func @transform_9(%arg0: i32, %arg1: i32, %arg2: i32) -> (i32, i32, i32, i32) {
    %c8_i32 = arith.constant 8 : i32
    %0 = arith.muli %arg2, %c8_i32 : i32
    %c9_i32 = arith.constant 9 : i32
    %1 = arith.addi %0, %c9_i32 : i32
    %c0_i32 = arith.constant 0 : i32
    %c0_i32_0 = arith.constant 0 : i32
    %c0_i32_1 = arith.constant 0 : i32
    return %arg0, %1, %c0_i32, %c0_i32_0 : i32, i32, i32, i32
  }
  func.func @transform_10(%arg0: i32, %arg1: i32, %arg2: i32) -> (i32, i32, i32) {
    %c0_i32 = arith.constant 0 : i32
    %c0_i32_0 = arith.constant 0 : i32
    %c0_i32_1 = arith.constant 0 : i32
    return %c0_i32, %c0_i32_0, %arg1 : i32, i32, i32
  }
  func.func @transform_11(%arg0: i32, %arg1: i32, %arg2: i32) -> (i32, i32) {
    %c0_i32 = arith.constant 0 : i32
    %c0_i32_0 = arith.constant 0 : i32
    return %c0_i32, %arg1 : i32, i32
  }
  func.func @transform_12(%arg0: i32, %arg1: i32, %arg2: i32) -> (i32, i32, i32) {
    %c0_i32 = arith.constant 0 : i32
    return %arg0, %arg2, %arg1 : i32, i32, i32
  }
}

</mosaic_0001>

<bundles_post_ra>
// kernel: tpu_custom_call.1
= control target key start
LH: loop header
LB: loop body
LE: loop exit
PB: predicated region body
PF: predicated region fallthrough
CT: control target
= control target key end

     0   :  { %s5573_s0 = inlined_call_operand.vmem [shape: bf16[2,18,18,16], index: 0, kind: input, shape index: {}]   ;;  %s5574_s1 = inlined_call_operand.vmem [shape: bf16[2,18,18,16], index: 1, kind: input, shape index: {}]   ;;  %s5575_s2 = inlined_call_operand.vmem [shape: bf16[2,18,18,16], index: 2, kind: input, shape index: {}]   ;;  %s5576_s3 = inlined_call_operand.vmem [shape: bf16[2,18,18,16], index: 3, kind: input, shape index: {}]   ;;  %s5577_s4 = inlined_call_operand.vmem [shape: bf16[2,18,18,16], index: 4, kind: input, shape index: {}]   ;;  %s5578_s5 = inlined_call_operand.vmem [shape: bf16[2,18,18,16], index: 5, kind: input, shape index: {}]   ;;  %s5579_s6 = inlined_call_operand.vmem [shape: bf16[2,18,18,16], index: 6, kind: input, shape index: {}]   ;;  %s5580_s7 = inlined_call_operand.vmem [shape: bf16[2,18,18,16], index: 7, kind: input, shape index: {}]   ;;  %s5581_s8 = inlined_call_operand.vmem [shape: bf16[2,18,18,16], index: 8, kind: input, shape index: {}]   ;;  %s5582_s9 = inlined_call_operand.vmem [shape: bf16[2,18,18,16], index: 9, kind: input, shape index: {}]   ;;  %s5583_s10 = inlined_call_operand.vmem [shape: bf16[9,16,128], index: 10, kind: input, shape index: {}]   ;;  %s5584_s11 = inlined_call_operand.vmem [shape: f32[1,128], index: 11, kind: input, shape index: {}]   ;;  %s5585_s12 = inlined_call_operand.hbm [shape: f32[2,256,128], index: 12, kind: output, shape index: {}]  }
   0x1   :  { %5600 = sst [smem:[#allocation36_spill]] %s5573_s0 }
   0x2   :  { %5601 = sst [smem:[#allocation37_spill]] %s5575_s2 }
   0x3   :  { %5602 = sst [smem:[#allocation38_spill]] %s5576_s3 }
   0x4   :  { %5603 = sst [smem:[#allocation39_spill]] %s5577_s4 }
   0x5   :  { %5604 = sst [smem:[#allocation40_spill]] %s5585_s12 }
   0x6   :  { %17 = vsyncpa [#allocation4], 0 }
   0x7   :  { %19 = vsyncpa [#allocation4 + $0x1], 0  ;;  %s4818_s21 = smov 0   ;;  %s4820_s22 = smov 0  }
   0x8   :  { %s4822_s23 = smov 0   ;;  %s4824_s24 = smov 0  }
   0x9   :  { %s4826_s25 = smov 0   ;;  %s4828_s26 = smov 0  }
   0xa   :  { %s4830_s27 = smov 0   ;;  %s4832_s28 = smov 0  }
   0xb LB: > { %5605 = sst [smem:[#allocation6_spill]] %s4720_s21  ;;  %s3926_s29 = sadd.s32 4294967295, %s4748_s28   ;;  %s4748_s28 = sphi %s4832_s28, %s25_s28   ;;  %s4744_s27 = sphi %s4830_s27, %s5674_s27   ;;  %s4740_s26 = sphi %s4828_s26, %s5673_s26   ;;  %s4736_s25 = sphi %s4826_s25, %s5677_s25   ;;  %s4732_s24 = sphi %s4824_s24, %s5671_s24   ;;  %s4728_s23 = sphi %s4822_s23, %s5670_s23   ;;  %s4724_s22 = sphi %s4820_s22, %s5676_s22   ;;  %s4720_s21 = sphi %s4818_s21, %s5675_s21  }
   0xc   : > { %5606 = sst [smem:[#allocation7_spill]] %s4728_s23  ;;  %s3927_s30 = sadd.s32 4294967294, %s4748_s28  }
   0xd   : > { %5607 = sst [smem:[#allocation8_spill]] %s4736_s25  ;;  %s37_s13 = sadd.s32 1, %s4740_s26 }
   0xe   : > { %5608 = sst [smem:[#allocation9_spill]] %s4740_s26  ;;  %p38_p0 = scmp.ge.s32.totalorder %s37_s13, 2 }
   0xf   : > { %5609 = sst [smem:[#allocation10_spill]] %s4744_s27  ;;  %s44_s14 = sadd.s32 1, %s4744_s27 }
  0x10   : > { %5610 = sst [smem:[#allocation11_spill]] %s4748_s28  ;;  %p435_p1 = scmp.ne.s32.totalorder %s4728_s23, %s4724_s22 }
  0x11   : > { %p436_p2 = scmp.eq.s32.totalorder %s3926_s29, 3  ;;  %s5679_s13 = smov (%p38_p0, %s37_s13), 0 }
  0x12   : > { %5611 = sst [smem:[#allocation12_spill]] %s5679_s13  ;;  %s5681_s14 = smov (!%p38_p0, %s44_s14), %s4744_s27 }
  0x13   : > { %s419_s15 = ssub.s32 %s4740_s26, %s5679_s13  ;;  %p4869_p3 = por %p436_p2, %p435_p1 }
  0x14   : > { %p46_p4 = scmp.ge.s32.totalorder %s5681_s14, 2  ;;  %p441_p5 = scmp.ne.s32.totalorder %s4724_s22, %s4720_s21 }
  0x15   : > { %s5612_s16 = scalar_select %p4869_p3, 1, 0 }
  0x16   : > { %p442_p6 = scmp.eq.s32.totalorder %s3927_s30, 3  ;;  %p3952_p7 = scmp.ge.s32.totalorder %s4748_s28, 1 }
  0x17   : > { %5613 = sst [smem:[#allocation13_spill]] %s5612_s16  ;;  %s5683_s14 = smov (%p46_p4, %s5681_s14), 0 }
  0x18   : > { %5614 = sst [smem:[#allocation14_spill]] %s5683_s14  ;;  %p4878_p8 = por %p442_p6, %p441_p5 }
  0x19   : > { %p631_p9 = scmp.lt.s32.totalorder %s4748_s28, 5  ;;  %s418_s18 = ssub.s32 %s4744_s27, %s5683_s14 }
  0x1a   : > { %s5615_s17 = scalar_select %p4878_p8, 1, 0 }
  0x1b   : > { %s425_s19 = sadd.s32 1, %s4728_s23  ;;  %s420_s20 = sor.u32 %s419_s15, %s418_s18 }
  0x1c   : > { %5616 = sst [smem:[#allocation15_spill]] %s5615_s17  ;;  %p632_p10 = pnand %p3952_p7, %p631_p9 }
  0x1d   : > { %p423_p11 = scmp.eq.s32.totalorder %s420_s20, 0 }
  0x1e   : > { %635 = sbr.rel (%p632_p10) target bundleno = 424 (0x1a8), region = 68 }
  0x1f   : > { %s4887_s29 = scalar_select %p423_p11, %s4728_s23, %s425_s19  }
  0x21   : > { %5617 = sst [smem:[#allocation16_spill]] %s4887_s29 }
  0x23   : > { %v4527_v0 = vld [vmem:[%s5583_s10] sm:$0xff]   ;;  %s4893_s30 = sshll.u32 %s4732_s24, 3  ;;  %p785_p12 = scmp.lt.s32.totalorder %s4736_s25, 1  ;;  %v4900_v1 = vld [vmem:[%s5583_s10 + $0x8] sm:$0xff]   ;;  %v4907_v2 = vld [vmem:[%s5583_s10 + $0x10] sm:$0xff]   ;;  %vm985_vm0 = vcmask 130048  }
  0x24   : > { %p787_p13 = scmp.lt.s32.totalorder %s4893_s30, 17  ;;  %4279 = vmatprep.subr.bf16.mxu0 %v4527_v0  ;;  %4441 = vmatprep.subr.bf16.mxu1 %v4527_v0  ;;  %s809_s26 = sadd.s32 2, %s4893_s30  ;;  %v4970_v10 = vld [vmem:[%s5583_s10 + $0x18] sm:$0xff]   ;;  %vm1155_vm1 = vsmask.f32 7424  ;;  %v5004_v23 = vld [vmem:[%s5583_s10 + $0x20] sm:$0xff]  }
  0x25   : > { %4280 = vmatpush3.bf16.msra.mxu0 %v4527_v0  ;;  %4442 = vmatpush3.bf16.msra.mxu1 %v4527_v0  ;;  %s786_s13 = scalar_select %p785_p12, %s4736_s25, 1  ;;  %vm1518_vm2 = vcmask 1046528   ;;  %v5036_v60 = vld [vmem:[%s5583_s10 + $0x28] sm:$0xff]  }
  0x26   : > { %s788_s14 = scalar_select %p787_p13, %s4893_s30, 17  ;;  %4297 = vmatprep.subr.bf16.mxu1 %v4900_v1  ;;  %4315 = vmatprep.subr.bf16.mxu0 %v4907_v2 }
  0x27   : > { %s4911_s27 = smul.u32 54, %s786_s13  ;;  %p812_p0 = scmp.lt.s32.totalorder %s809_s26, 17 }
  0x28   : > { %s4443_s15 = smul.u32 3, %s788_s14  ;;  %s822_s18 = sadd.s32 3, %s4893_s30 }
  0x29   : > { %s5685_s26 = smov (!%p812_p0, %s809_s26), 17  ;;  %s835_s23 = sadd.s32 4, %s4893_s30 }
  0x2a   : > { %s791_s29 = sadd.s32 %s4911_s27, %s4443_s15  ;;  %s4446_s20 = smul.u32 3, %s5685_s26 }
  0x2b   : > { %s3955_s19 = sshll.u32 %s791_s29, 2  ;;  %s5618_s0 = sld [smem:[#allocation36_spill]] }
  0x2c   : > { %p825_p1 = scmp.lt.s32.totalorder %s822_s18, 17  ;;  %s816_s13 = sadd.s32 %s4446_s20, %s4911_s27 }
  0x2d   : > { %p838_p2 = scmp.lt.s32.totalorder %s835_s23, 17  ;;  %s3959_s14 = sshll.u32 %s816_s13, 2 }
  0x2e   : > { %s848_s15 = sadd.s32 5, %s4893_s30  ;;  %s5619_s2 = sld [smem:[#allocation37_spill]] }
  0x2f   : > { %s861_s21 = sadd.s32 6, %s4893_s30  ;;  %s5687_s18 = smov (!%p825_p1, %s822_s18), 17 }
  0x30   : > { %s5689_s23 = smov (!%p838_p2, %s835_s23), 17  ;;  %s4447_s17 = smul.u32 3, %s5687_s18 }
  0x31   : > { %s4920_s28 = scalar_lea.vmem %s5618_s0, %s3955_s19  ;;  %p851_p4 = scmp.lt.s32.totalorder %s848_s15, 17 }
  0x32   : > { %v4528_v3 = vld [vmem:[%s4920_s28] sm:$0xff]   ;;  %s4448_s19 = smul.u32 3, %s5689_s23  ;;  %p864_p5 = scmp.lt.s32.totalorder %s861_s21, 17  ;;  %v4541_v7 = vld [vmem:[%s4920_s28 + $0x8] ss:$0 sps:$4 sm:$0x11]  }
  0x33   : > { %4281 = vmatprep.mubr.msk.bf16.mxu0 %vm985_vm0, %v4528_v3  ;;  %s829_s20 = sadd.s32 %s4447_s17, %s4911_s27  ;;  %s5599_s0 = sadd.s32 7, %s4893_s30  ;;  %v4540_v4 = vld [vmem:[%s4920_s28] sm:$0xff]   ;;  %v1164_v13 = vshll.u32 %v4541_v7, 16  ;;  %v4539_v15 = vld [vmem:[%s4920_s28 + $0x8] ss:$0 sps:$4 sm:$0x11]  }
  0x34   : > { %s4928_s26 = scalar_lea.vmem %s5619_s2, %s3959_s14  ;;  %s3961_s13 = sshll.u32 %s829_s20, 2  ;;  %v1159_v6 = vshll.u32 %v4540_v4, 16  ;;  %v1157_v8 = vshrl.u32 %v4540_v4, 16  ;;  %v4538_v12 = vld [vmem:[%s4920_s28] sm:$0xfe]   ;;  %v1520_v22 = vrot.slane %v4539_v15, 1 }
  0x35   : > { %s842_s16 = sadd.s32 %s4448_s19, %s4911_s27  ;;  %s5620_s3 = sld [smem:[#allocation38_spill]]  ;;  %v4550_v16 = vld [vmem:[%s4928_s26] sm:$0xff]   ;;  %v1166_v18 = vrot.slane %v1164_v13, 1  ;;  %v4551_v19 = vld [vmem:[%s4928_s26 + $0x8] ss:$0 sps:$4 sm:$0x11]  }
  0x36   : > { %s3963_s2 = sshll.u32 %s842_s16, 2  ;;  %s5621_s4 = sld [smem:[#allocation39_spill]]  ;;  %v1161_v9 = vrot.slane %v1159_v6, 1  ;;  %v4534_v20 = vld [vmem:[%s4928_s26] sm:$0xff]   ;;  %v1519_v21 = vrot.slane %v4538_v12, 1  ;;  %v1199_v24 = vshll.u32 %v4550_v16, 16 }
  0x37   : > { %s796_s17 = sadd.s32 1, %s4893_s30  ;;  %s5691_s15 = smov (!%p851_p4, %s848_s15), 17  ;;  %v1197_v28 = vshrl.u32 %v4550_v16, 16  ;;  %v1204_v30 = vshll.u32 %v4551_v19, 16  ;;  %v4548_v32 = vld [vmem:[%s4928_s26] sm:$0xfe]  }
  0x38   : > { %s5693_s21 = smov (!%p864_p5, %s861_s21), 17  ;;  %s4449_s19 = smul.u32 3, %s5691_s15  ;;  %v1162_v17 = vor.u32 %v1161_v9, %v1157_v8  ;;  %v1201_v33 = vrot.slane %v1199_v24, 1  ;;  %v4549_v44 = vld [vmem:[%s4928_s26 + $0x8] ss:$0 sps:$4 sm:$0x11]   ;;  %v1521_v49 = vsel %vm1518_vm2, %v1519_v21, %v1520_v22 }
  0x39   : > { %p4950_p6 = scmp.lt.s32.totalorder %s5599_s0, 17  ;;  %s4450_s25 = smul.u32 3, %s5693_s21  ;;  %v1206_v46 = vrot.slane %v1204_v30, 1  ;;  %v1541_v52 = vrot.slane %v4548_v32, 1  ;;  %v1542_v4 = vrot.slane %v4549_v44, 1  ;;  %v5058_v21 = vld [vmem:[%s5583_s10 + $0x30] sm:$0xff]  }
  0x3a   : > { %p4955_p7 = scmp.lt.s32.totalorder %s796_s17, 17  ;;  %s855_s16 = sadd.s32 %s4449_s19, %s4911_s27  ;;  %v1167_v27 = vsel %vm1155_vm1, %v1162_v17, %v1166_v18  ;;  %v1202_v45 = vor.u32 %v1201_v33, %v1197_v28 }
  0x3b   : > { %s4939_s29 = scalar_lea.vmem %s5620_s3, %s3961_s13  ;;  %s3965_s15 = sshll.u32 %s855_s16, 2  ;;  %v1543_v18 = vsel %vm1518_vm2, %v1541_v52, %v1542_v4 }
  0x3c   : > { %s4944_s23 = scalar_lea.vmem %s5621_s4, %s3963_s2  ;;  %s868_s13 = sadd.s32 %s4450_s25, %s4911_s27  ;;  %v4554_v25 = vld [vmem:[%s4939_s29] sm:$0xff]   ;;  %v4555_v34 = vld [vmem:[%s4939_s29 + $0x8] ss:$0 sps:$4 sm:$0x11]   ;;  %v1207_v61 = vsel %vm1155_vm1, %v1202_v45, %v1206_v46 }
  0x3d   : > { %v4530_v5 = vld [vmem:[%s4944_s23] sm:$0xff]   ;;  %s4965_s18 = scalar_lea.vmem %s5578_s5, %s3965_s15  ;;  %s3967_s0 = sshll.u32 %s868_s13, 2  ;;  %v1219_v38 = vshll.u32 %v4554_v25, 16  ;;  %v4559_v47 = vld [vmem:[%s4944_s23 + $0x8] ss:$0 sps:$4 sm:$0x11]  }
  0x3e   : > { %4289 = vmatprep.mubr.msk.bf16.mxu1 %vm985_vm0, %v4530_v5  ;;  %s4975_s16 = scalar_lea.vmem %s5579_s6, %s3967_s0  ;;  %v4532_v11 = vld [vmem:[%s4965_s18] sm:$0xff]   ;;  %s5624_s25 = sadd.s32 7, %s4893_s30  ;;  %v1217_v53 = vshrl.u32 %v4554_v25, 16  ;;  %v1224_v54 = vshll.u32 %v4555_v34, 16  ;;  %v1244_v63 = vshll.u32 %v4559_v47, 16 }
  0x3f   : > { %s5695_s25 = smov (!%p4950_p6, %s5624_s25), 17  ;;  %v4536_v14 = vld [vmem:[%s4975_s16] sm:$0xff]   ;;  %s5697_s17 = smov (!%p4955_p7, %s796_s17), 17  ;;  %4290 = vmatmul.mubr.msk.bf16.vlgmr.msra.gmra.mxu1 %vm985_vm0, %v4532_v11  ;;  %v1221_v56 = vrot.slane %v1219_v38, 1 }
  0x40   : > { %s4451_s3 = smul.u32 3, %s5695_s25  ;;  %4298 = vmatpush3.bf16.msra.mxu1 %v4900_v1  ;;  %4293 = vmatprep.mubr.msk.bf16.mxu1 %vm985_vm0, %v4536_v14  ;;  %v4558_v35 = vld [vmem:[%s4944_s23] sm:$0xff]   ;;  %v4563_v5 = vld [vmem:[%s4965_s18 + $0x8] ss:$0 sps:$4 sm:$0x11]   ;;  %v1226_v8 = vrot.slane %v1224_v54, 1 }
  0x41   : > { %s4445_s0 = smul.u32 3, %s5697_s17  ;;  %4333 = vmatprep.subr.bf16.mxu1 %v4970_v10  ;;  %v4535_v36 = vld [vmem:[%s4939_s29] sm:$0xff]   ;;  %v1239_v48 = vshll.u32 %v4558_v35, 16  ;;  %v1237_v57 = vshrl.u32 %v4558_v35, 16  ;;  %v1222_v7 = vor.u32 %v1221_v56, %v1217_v53  ;;  %v1246_v14 = vrot.slane %v1244_v63, 1  ;;  %s887_s15 = sadd.s32 8, %s4893_s30 }
  0x42   : > { %s881_s4 = sadd.s32 %s4451_s3, %s4911_s27  ;;  %v4562_v59 = vld [vmem:[%s4965_s18] sm:$0xff]   ;;  %v4553_v6 = vld [vmem:[%s4939_s29 + $0x8] ss:$0 sps:$4 sm:$0x11]   ;;  %p890_p9 = scmp.lt.s32.totalorder %s887_s15, 17 }
  0x43   : > { %s3969_s20 = sshll.u32 %s881_s4, 2  ;;  %s803_s2 = sadd.s32 %s4445_s0, %s4911_s27  ;;  %v1241_v58 = vrot.slane %v1239_v48, 1  ;;  %v4552_v62 = vld [vmem:[%s4939_s29] sm:$0xfe]   ;;  %v1259_v9 = vshll.u32 %v4562_v59, 16  ;;  %v1257_v19 = vshrl.u32 %v4562_v59, 16  ;;  %v1227_v22 = vsel %vm1155_vm1, %v1222_v7, %v1226_v8 }
  0x44   : > { %s4999_s13 = scalar_lea.vmem %s5580_s7, %s3969_s20  ;;  %s3957_s17 = sshll.u32 %s803_s2, 2  ;;  %v4566_v0 = vld [vmem:[%s4975_s16] sm:$0xff]   ;;  %v4557_v12 = vld [vmem:[%s4944_s23 + $0x8] ss:$0 sps:$4 sm:$0x11]   ;;  %v1553_v30 = vrot.slane %v4553_v6, 1 }
  0x45   : > { %s5010_s25 = scalar_lea.vmem %s5574_s1, %s3957_s17  ;;  %v4537_v26 = vld [vmem:[%s4999_s13] sm:$0xff]   ;;  %v1242_v13 = vor.u32 %v1241_v58, %v1237_v57  ;;  %v1279_v15 = vshll.u32 %v4566_v0, 16  ;;  %v4567_v17 = vld [vmem:[%s4975_s16 + $0x8] ss:$0 sps:$4 sm:$0x11]   ;;  %v1261_v24 = vrot.slane %v1259_v9, 1 }
  0x46   : > { %v4529_v29 = vld [vmem:[%s5010_s25] sm:$0xff]   ;;  %v4546_v37 = vld [vmem:[%s5010_s25 + $0x8] ss:$0 sps:$4 sm:$0x11]   ;;  %v1564_v32 = vrot.slane %v4557_v12, 1  ;;  %s5699_s15 = smov (!%p890_p9, %s887_s15), 17 }
  0x47   : > { %4294 = vmatmul.mubr.msk.bf16.gmra.mxu1 %vm985_vm0, %v4537_v26  ;;  %4282 = vmatmul.mubr.msk.bf16.vlgmr.msra.gmra.mxu0 %vm985_vm0, %v4529_v29  ;;  %v4545_v31 = vld [vmem:[%s5010_s25] sm:$0xff]   ;;  %v4543_v40 = vld [vmem:[%s5010_s25 + $0x8] ss:$0 sps:$4 sm:$0x11]   ;;  %v1184_v43 = vshll.u32 %v4546_v37, 16  ;;  %v1247_v26 = vsel %vm1155_vm1, %v1242_v13, %v1246_v14  ;;  %v1281_v28 = vrot.slane %v1279_v15, 1 }
  0x48   : > { %4299 = vmatprep.mubr.msk.bf16.mxu1 %vm985_vm0, %v1167_v27  ;;  %4316 = vmatpush3.bf16.msra.mxu0 %v4907_v2  ;;  %v4542_v39 = vld [vmem:[%s5010_s25] sm:$0xfe]   ;;  %v1177_v41 = vshrl.u32 %v4545_v31, 16  ;;  %v1179_v42 = vshll.u32 %v4545_v31, 16  ;;  %v1531_v2 = vrot.slane %v4543_v40, 1  ;;  %v1277_v27 = vshrl.u32 %v4566_v0, 16 }
  0x49   : > { %4285 = vmatprep.mubr.msk.bf16.mxu0 %vm985_vm0, %v4534_v20  ;;  %4351 = vmatprep.subr.bf16.mxu0 %v5004_v23  ;;  %v1186_v51 = vrot.slane %v1184_v43, 1  ;;  %v1530_v1 = vrot.slane %v4542_v39, 1  ;;  %v4556_v11 = vld [vmem:[%s4944_s23] sm:$0xfe]   ;;  %v1264_v20 = vshll.u32 %v4563_v5, 16  ;;  %v1284_v29 = vshll.u32 %v4567_v17, 16 }
  0x4a   : > { %v1181_v50 = vrot.slane %v1179_v42, 1  ;;  %v4570_v25 = vld [vmem:[%s4999_s13] sm:$0xff]   ;;  %v1563_v31 = vrot.slane %v4556_v11, 1  ;;  %v4561_v35 = vld [vmem:[%s4965_s18 + $0x8] ss:$0 sps:$4 sm:$0x11]   ;;  %v1282_v39 = vor.u32 %v1281_v28, %v1277_v27 }
  0x4b   : > { %v1532_v16 = vsel %vm1518_vm2, %v1530_v1, %v1531_v2  ;;  %v4560_v33 = vld [vmem:[%s4965_s18] sm:$0xfe]   ;;  %v1266_v34 = vrot.slane %v1264_v20, 1  ;;  %v4571_v37 = vld [vmem:[%s4999_s13 + $0x8] ss:$0 sps:$4 sm:$0x11]  }
  0x4c   : > { %v1182_v55 = vor.u32 %v1181_v50, %v1177_v41  ;;  %v4565_v38 = vld [vmem:[%s4975_s16 + $0x8] ss:$0 sps:$4 sm:$0x11]   ;;  %v1286_v40 = vrot.slane %v1284_v29, 1  ;;  %v4564_v42 = vld [vmem:[%s4975_s16] sm:$0xfe]   ;;  %v1565_v43 = vsel %vm1518_vm2, %v1563_v31, %v1564_v32 }
  0x4d   : > { %v4572_v44 = vld [vmem:[%s5010_s25] sm:$0xff]   ;;  %v1297_v46 = vshrl.u32 %v4570_v25, 16  ;;  %v1304_v48 = vshll.u32 %v4571_v37, 16  ;;  %v1575_v52 = vrot.slane %v4561_v35, 1  ;;  %v1585_v53 = vrot.slane %v4564_v42, 1  ;;  %v5109_v31 = vld [vmem:[%s5583_s10 + $0x38] sm:$0xff]  }
  0x4e   : > { %v1187_v3 = vsel %vm1155_vm1, %v1182_v55, %v1186_v51  ;;  %v1287_v50 = vsel %vm1155_vm1, %v1282_v39, %v1286_v40  ;;  %v4573_v51 = vld [vmem:[%s5010_s25 + $0x8] ss:$0 sps:$4 sm:$0x11]   ;;  %v1586_v54 = vrot.slane %v4565_v38, 1  ;;  %v2046_v55 = vshll.u32 %v4572_v44, 16  ;;  %v4574_v5 = vld [vmem:[%s5010_s25] sm:$0xff]  }
  0x4f   : > { %4286 = vmatmul.mubr.msk.bf16.gmra.mxu0 %vm985_vm0, %v4535_v36  ;;  %4300 = vmatmul.mubr.msk.bf16.vlgmr.msra.gmra.mxu1 %vm985_vm0, %v1187_v3  ;;  %v1262_v36 = vor.u32 %v1261_v24, %v1257_v19  ;;  %v4568_v56 = vld [vmem:[%s4999_s13] sm:$0xfe]   ;;  %v1306_v58 = vrot.slane %v1304_v48, 1  ;;  %v4569_v59 = vld [vmem:[%s4999_s13 + $0x8] ss:$0 sps:$4 sm:$0x11]  }
  0x50   : > { %4317 = vmatprep.mubr.msk.bf16.mxu0 %vm985_vm0, %v1521_v49  ;;  %4334 = vmatpush3.bf16.msra.mxu1 %v4970_v10  ;;  %v1552_v10 = vrot.slane %v4552_v62, 1  ;;  %v1574_v49 = vrot.slane %v4560_v33, 1  ;;  %v4575_v62 = vld [vmem:[%s4928_s26] sm:$0xff]   ;;  %v1587_v63 = vsel %vm1518_vm2, %v1585_v53, %v1586_v54  ;;  %v2044_v0 = vshrl.u32 %v4572_v44, 16  ;;  %s4452_s14 = smul.u32 3, %s5699_s15  ;;  %s900_s19 = sadd.s32 9, %s4893_s30 }
  0x51   : > { %4303 = vmatprep.mubr.msk.bf16.mxu1 %vm985_vm0, %v1207_v61  ;;  %4369 = vmatprep.subr.bf16.mxu1 %v5036_v60  ;;  %v1267_v45 = vsel %vm1155_vm1, %v1262_v36, %v1266_v34  ;;  %v2048_v1 = vrot.slane %v2046_v55, 1  ;;  %v2051_v2 = vshll.u32 %v4573_v51, 16  ;;  %v4580_v3 = vld [vmem:[%s4939_s29] sm:$0xff]   ;;  %v4576_v6 = vld [vmem:[%s4928_s26 + $0x8] ss:$0 sps:$4 sm:$0x11]  }
  0x52   : > { %v1554_v41 = vsel %vm1518_vm2, %v1552_v10, %v1553_v30  ;;  %v1576_v61 = vsel %vm1518_vm2, %v1574_v49, %v1575_v52  ;;  %v1596_v7 = vrot.slane %v4568_v56, 1  ;;  %v1597_v8 = vrot.slane %v4569_v59, 1  ;;  %v4581_v13 = vld [vmem:[%s4939_s29 + $0x8] ss:$0 sps:$4 sm:$0x11]   ;;  %v4583_v17 = vld [vmem:[%s4944_s23] sm:$0xff]   ;;  %s894_s21 = sadd.s32 %s4452_s14, %s4911_s27 }
  0x53   : > { %v2066_v9 = vshll.u32 %v4575_v62, 16  ;;  %v2049_v11 = vor.u32 %v2048_v1, %v2044_v0  ;;  %v2053_v12 = vrot.slane %v2051_v2, 1  ;;  %v2086_v14 = vshll.u32 %v4580_v3, 16  ;;  %v4582_v27 = vld [vmem:[%s4939_s29] sm:$0xff]   ;;  %s3971_s3 = sshll.u32 %s894_s21, 2  ;;  %p903_p10 = scmp.lt.s32.totalorder %s900_s19, 17 }
  0x54   : > { %v2071_v15 = vshll.u32 %v4576_v6, 16  ;;  %v2064_v10 = vshrl.u32 %v4575_v62, 16  ;;  %v2084_v20 = vshrl.u32 %v4580_v3, 16  ;;  %v4584_v28 = vld [vmem:[%s4944_s23 + $0x8] ss:$0 sps:$4 sm:$0x11]   ;;  %s5142_s20 = scalar_lea.vmem %s5581_s8, %s3971_s3 }
  0x55   : > { %v2068_v19 = vrot.slane %v2066_v9, 1  ;;  %v2054_v24 = vsel %vm1155_vm1, %v2049_v11, %v2053_v12  ;;  %v2106_v30 = vshll.u32 %v4583_v17, 16  ;;  %v4587_v33 = vld [vmem:[%s4965_s18 + $0x8] ss:$0 sps:$4 sm:$0x11]   ;;  %v2104_v37 = vshrl.u32 %v4583_v17, 16 }
  0x56   : > { %v2073_v29 = vrot.slane %v2071_v15, 1  ;;  %v4585_v39 = vld [vmem:[%s4944_s23] sm:$0xff]   ;;  %v4593_v53 = vld [vmem:[%s4999_s13 + $0x8] ss:$0 sps:$4 sm:$0x11]   ;;  %s5701_s19 = smov (!%p903_p10, %s900_s19), 17 }
  0x57   : > { %4318 = vmatmul.mubr.msk.bf16.vlgmr.msra.gmra.mxu0 %vm985_vm0, %v1532_v16  ;;  %4304 = vmatmul.mubr.msk.bf16.gmra.mxu1 %vm985_vm0, %v1227_v22  ;;  %v4578_v16 = vld [vmem:[%s4928_s26] sm:$0xff]   ;;  %v2069_v32 = vor.u32 %v2068_v19, %v2064_v10  ;;  %v2108_v38 = vrot.slane %v2106_v30, 1  ;;  %v2171_v1 = vshll.u32 %v4593_v53, 16  ;;  %s4453_s30 = smul.u32 3, %s5701_s19  ;;  %s4193_s17 = sshll.u32 %s4732_s24, 4 }
  0x58   : > { %4352 = vmatpush3.bf16.msra.mxu0 %v5004_v23  ;;  %4321 = vmatprep.mubr.msk.bf16.mxu0 %vm985_vm0, %v1543_v18  ;;  %v1299_v23 = vshll.u32 %v4570_v25, 16  ;;  %v1598_v18 = vsel %vm1518_vm2, %v1596_v7, %v1597_v8  ;;  %v4586_v22 = vld [vmem:[%s4965_s18] sm:$0xff]   ;;  %v2088_v25 = vrot.slane %v2086_v14, 1  ;;  %v4596_v7 = vld [vmem:[%s5142_s20 + $0x8] ss:$0 sps:$4 sm:$0x11]  }
  0x59   : > { %4387 = vmatprep.subr.bf16.mxu0 %v5058_v21  ;;  %4307 = vmatprep.mubr.msk.bf16.mxu1 %vm985_vm0, %v1247_v26  ;;  %v2091_v26 = vshll.u32 %v4581_v13, 16  ;;  %v2126_v34 = vshll.u32 %v4586_v22, 16  ;;  %v2124_v40 = vshrl.u32 %v4586_v22, 16  ;;  %v4589_v44 = vld [vmem:[%s4975_s16] sm:$0xff]   ;;  %v2173_v11 = vrot.slane %v2171_v1, 1  ;;  %s5665_s4 = sld [smem:[#allocation40_spill]] }
  0x5a   : > { %v1301_v47 = vrot.slane %v1299_v23, 1  ;;  %v2089_v35 = vor.u32 %v2088_v25, %v2084_v20  ;;  %v2111_v23 = vshll.u32 %v4584_v28, 16  ;;  %v4588_v48 = vld [vmem:[%s4965_s18] sm:$0xff]   ;;  %v2146_v52 = vshll.u32 %v4589_v44, 16 }
  0x5b   : > { %v2093_v36 = vrot.slane %v2091_v26, 1  ;;  %v2128_v42 = vrot.slane %v2126_v34, 1  ;;  %v4591_v56 = vld [vmem:[%s4975_s16] sm:$0xff]   ;;  %v4604_v20 = vld [vmem:[%s4928_s26 + $0x8] ss:$0 sps:$4 sm:$0x11]  }
  0x5c   : > { %v1302_v57 = vor.u32 %v1301_v47, %v1297_v46  ;;  %v4590_v46 = vld [vmem:[%s4975_s16 + $0x8] ss:$0 sps:$4 sm:$0x11]   ;;  %v4592_v47 = vld [vmem:[%s4999_s13] sm:$0xff]   ;;  %v2113_v49 = vrot.slane %v2111_v23, 1  ;;  %v2148_v59 = vrot.slane %v2146_v52, 1 }
  0x5d   : > { %v2129_v54 = vor.u32 %v2128_v42, %v2124_v40  ;;  %v2166_v55 = vshll.u32 %v4592_v47, 16  ;;  %v4595_v62 = vld [vmem:[%s5142_s20] sm:$0xff]   ;;  %v4608_v22 = vld [vmem:[%s4939_s29 + $0x8] ss:$0 sps:$4 sm:$0x11]  }
  0x5e   : > { %v1307_v4 = vsel %vm1155_vm1, %v1302_v57, %v1306_v58  ;;  %v2144_v58 = vshrl.u32 %v4589_v44, 16  ;;  %v4594_v2 = vld [vmem:[%s4999_s13] sm:$0xff]   ;;  %v2186_v8 = vshll.u32 %v4595_v62, 16  ;;  %v2184_v13 = vshrl.u32 %v4595_v62, 16 }
  0x5f   : > { %4322 = vmatmul.mubr.msk.bf16.gmra.mxu0 %vm985_vm0, %v1554_v41  ;;  %4308 = vmatmul.mubr.msk.bf16.gmra.mxu1 %vm985_vm0, %v1267_v45  ;;  %v5122_v41 = vld [vmem:[%s5583_s10 + $0x40] sm:$0xff]   ;;  %v2094_v45 = vsel %vm1155_vm1, %v2089_v35, %v2093_v36  ;;  %v2168_v0 = vrot.slane %v2166_v55, 1  ;;  %v4611_v35 = vld [vmem:[%s4944_s23 + $0x8] ss:$0 sps:$4 sm:$0x11]  }
  0x60   : > { %4325 = vmatprep.mubr.msk.bf16.mxu0 %vm985_vm0, %v1565_v43  ;;  %4311 = vmatprep.mubr.msk.bf16.mxu1 %vm985_vm0, %v1287_v50  ;;  %v2131_v43 = vshll.u32 %v4587_v33, 16  ;;  %v2109_v50 = vor.u32 %v2108_v38, %v2104_v37  ;;  %v4599_v3 = vld [vmem:[%s5010_s25] sm:$0xfe]   ;;  %v2149_v6 = vor.u32 %v2148_v59, %v2144_v58  ;;  %v2188_v17 = vrot.slane %v2186_v8, 1 }
  0x61   : > { %v2405_v12 = vrot.slane %v4599_v3, 1  ;;  %v4603_v15 = vld [vmem:[%s4928_s26] sm:$0xfe]   ;;  %v2439_v42 = vrot.slane %v4611_v35, 1 }
  0x62   : > { %v2133_v51 = vrot.slane %v2131_v43, 1  ;;  %v2114_v57 = vsel %vm1155_vm1, %v2109_v50, %v2113_v49  ;;  %v4597_v19 = vld [vmem:[%s5142_s20] sm:$0xff]   ;;  %v2189_v26 = vor.u32 %v2188_v17, %v2184_v13  ;;  %v2416_v28 = vrot.slane %v4603_v15, 1  ;;  %v4620_v50 = vld [vmem:[%s4999_s13 + $0x8] ss:$0 sps:$4 sm:$0x11]  }
  0x63   : > { %v4607_v25 = vld [vmem:[%s4939_s29] sm:$0xfe]   ;;  %v2472_v58 = vrot.slane %v4620_v50, 1  ;;  %v4629_v35 = vld [vmem:[%s4939_s29 + $0x8] ss:$0 sps:$4 sm:$0x11]  }
  0x64   : > { %v2427_v30 = vrot.slane %v4607_v25, 1  ;;  %v4598_v34 = vld [vmem:[%s4928_s26] sm:$0xff]  }
  0x65   : > { %v4610_v37 = vld [vmem:[%s4944_s23] sm:$0xfe]  }
  0x66   : > { %v4613_v38 = vld [vmem:[%s4965_s18] sm:$0xfe]  }
  0x67   : > { %4326 = vmatmul.mubr.msk.bf16.gmra.mxu0 %vm985_vm0, %v1576_v61  ;;  %4312 = vmatmul.mubr.msk.bf16.gmra.mxu1 %vm985_vm0, %v1307_v4  ;;  %v2164_v61 = vshrl.u32 %v4592_v47, 16  ;;  %v4601_v40 = vld [vmem:[%s4939_s29] sm:$0xff]   ;;  %v2449_v44 = vrot.slane %v4613_v38, 1 }
  0x68   : > { %4329 = vmatprep.mubr.msk.bf16.mxu0 %vm985_vm0, %v1587_v63  ;;  %4335 = vmatprep.mubr.msk.bf16.mxu1 %vm985_vm0, %v4574_v5  ;;  %v2134_v63 = vsel %vm1155_vm1, %v2129_v54, %v2133_v51  ;;  %v4600_v5 = vld [vmem:[%s5010_s25 + $0x8] ss:$0 sps:$4 sm:$0x11]   ;;  %s907_s25 = sadd.s32 %s4453_s30, %s4911_s27  ;;  %v4606_v43 = vld [vmem:[%s4944_s23] sm:$0xff]  }
  0x69   : > { %v2169_v9 = vor.u32 %v2168_v0, %v2164_v61  ;;  %v2406_v14 = vrot.slane %v4600_v5, 1  ;;  %s3973_s2 = sshll.u32 %s907_s25, 2  ;;  %v4616_v47 = vld [vmem:[%s4975_s16] sm:$0xfe]  }
  0x6a   : > { %s5175_s15 = scalar_lea.vmem %s5582_s9, %s3973_s2  ;;  %v4619_v51 = vld [vmem:[%s4999_s13] sm:$0xfe]   ;;  %v2460_v54 = vrot.slane %v4616_v47, 1  ;;  %v4623_v0 = vld [vmem:[%s5142_s20 + $0x8] ss:$0 sps:$4 sm:$0x11]  }
  0x6b   : > { %v2174_v10 = vsel %vm1155_vm1, %v2169_v9, %v2173_v11  ;;  %v4609_v53 = vld [vmem:[%s4965_s18] sm:$0xff]   ;;  %v4631_v5 = vld [vmem:[%s4939_s29 + $0x8] ss:$0 sps:$4 sm:$0x11]   ;;  %v2483_v11 = vrot.slane %v4623_v0, 1  ;;  %s4750_s2 = smov [#allocation3]  }
  0x6c   : > { %v4630_v55 = vld [vmem:[%s4939_s29] sm:$0xff]   ;;  %s4660_s27 = sshll.u32 %s4750_s2, 4  ;;  %s4661_s27 = int_to_ptr.vmem [resolvable:$false] %s4660_s27 }
  0x6d   : > { %v4612_v59 = vld [vmem:[%s4975_s16] sm:$0xff]   ;;  %s4662_s28 = scalar_lea.vmem %s4661_s27, 4096 }
  0x6e   : > { %v4634_v3 = vld [vmem:[%s4944_s23] sm:$0xff]  }
  0x6f   : > { %4330 = vmatmul.mubr.msk.bf16.gmra.mxu0 %vm985_vm0, %v1598_v18  ;;  %4336 = vmatmul.mubr.msk.bf16.vlgmr.msra.gmra.mxu1 %vm985_vm0, %v4578_v16  ;;  %v2191_v18 = vshll.u32 %v4596_v7, 16  ;;  %v2950_v7 = vshrl.u32 %v4630_v55, 16  ;;  %v4618_v8 = vld [vmem:[%s5142_s20] sm:$0xff]   ;;  %v2972_v13 = vshll.u32 %v4634_v3, 16  ;;  %v2970_v25 = vshrl.u32 %v4634_v3, 16 }
  0x70   : > { %4353 = vmatprep.mubr.msk.bf16.mxu0 %vm985_vm0, %v2054_v24  ;;  %4370 = vmatpush3.bf16.msra.mxu1 %v5036_v60  ;;  %v2074_v60 = vsel %vm1155_vm1, %v2069_v32, %v2073_v29  ;;  %v2407_v24 = vsel %vm1518_vm2, %v2405_v12, %v2406_v14  ;;  %v2417_v29 = vrot.slane %v4604_v20, 1  ;;  %v2428_v32 = vrot.slane %v4608_v22, 1  ;;  %v4624_v17 = vld [vmem:[%s4928_s26] sm:$0xfe]  }
  0x71   : > { %4339 = vmatprep.mubr.msk.bf16.mxu1 %vm985_vm0, %v4582_v27  ;;  %4405 = vmatprep.subr.bf16.mxu1 %v5109_v31  ;;  %v2193_v27 = vrot.slane %v2191_v18, 1  ;;  %v4625_v18 = vld [vmem:[%s4928_s26 + $0x8] ss:$0 sps:$4 sm:$0x11]   ;;  %v4642_v20 = vld [vmem:[%s4975_s16] sm:$0xff]  }
  0x72   : > { %v2418_v36 = vsel %vm1518_vm2, %v2416_v28, %v2417_v29  ;;  %v2429_v23 = vsel %vm1518_vm2, %v2427_v30, %v2428_v32  ;;  %v3291_v28 = vrot.slane %v4624_v17, 1  ;;  %v4639_v29 = vld [vmem:[%s4965_s18 + $0x8] ss:$0 sps:$4 sm:$0x11]   ;;  %v3292_v30 = vrot.slane %v4625_v18, 1  ;;  %v4621_v38 = vld [vmem:[%s5175_s15] sm:$0xff]  }
  0x73   : > { %v2194_v33 = vsel %vm1155_vm1, %v2189_v26, %v2193_v27  ;;  %v2974_v26 = vrot.slane %v2972_v13, 1 }
  0x77   : > { %4354 = vmatmul.mubr.msk.bf16.vlgmr.msra.gmra.mxu0 %vm985_vm0, %v2074_v60  ;;  %4340 = vmatmul.mubr.msk.bf16.gmra.mxu1 %vm985_vm0, %v4585_v39  ;;  %v4614_v39 = vld [vmem:[%s4965_s18 + $0x8] ss:$0 sps:$4 sm:$0x11]   ;;  %v2438_v60 = vrot.slane %v4610_v37, 1 }
  0x78   : > { %4388 = vmatpush3.bf16.msra.mxu0 %v5058_v21  ;;  %4357 = vmatprep.mubr.msk.bf16.mxu0 %vm985_vm0, %v2094_v45  ;;  %v2151_v21 = vshll.u32 %v4590_v46, 16  ;;  %v2450_v45 = vrot.slane %v4614_v39, 1  ;;  %v4626_v46 = vld [vmem:[%s4928_s26] sm:$0xff]   ;;  %v4643_v37 = vld [vmem:[%s4975_s16 + $0x8] ss:$0 sps:$4 sm:$0x11]  }
  0x79   : > { %4423 = vmatprep.subr.bf16.mxu0 %v5122_v41  ;;  %4343 = vmatprep.mubr.msk.bf16.mxu1 %vm985_vm0, %v4588_v48  ;;  %v4617_v48 = vld [vmem:[%s4975_s16 + $0x8] ss:$0 sps:$4 sm:$0x11]   ;;  %v2440_v49 = vsel %vm1518_vm2, %v2438_v60, %v2439_v42  ;;  %v2932_v52 = vshll.u32 %v4626_v46, 16  ;;  %v2930_v61 = vshrl.u32 %v4626_v46, 16  ;;  %v2997_v46 = vshll.u32 %v4639_v29, 16 }
  0x7a   : > { %v2153_v4 = vrot.slane %v2151_v21, 1  ;;  %v2461_v21 = vrot.slane %v4617_v48, 1  ;;  %v4632_v39 = vld [vmem:[%s4944_s23] sm:$0xfe]   ;;  %v3010_v48 = vshrl.u32 %v4642_v20, 16  ;;  %v3017_v50 = vshll.u32 %v4643_v37, 16 }
  0x7b   : > { %v2934_v62 = vrot.slane %v2932_v52, 1  ;;  %v4633_v42 = vld [vmem:[%s4944_s23 + $0x8] ss:$0 sps:$4 sm:$0x11]  }
  0x7c   : > { %v2154_v16 = vsel %vm1155_vm1, %v2149_v6, %v2153_v4  ;;  %v4615_v6 = vld [vmem:[%s4999_s13] sm:$0xff]   ;;  %v4645_v29 = vld [vmem:[%s4999_s13 + $0x8] ss:$0 sps:$4 sm:$0x11]  }
  0x7d   : > { %v2935_v14 = vor.u32 %v2934_v62, %v2930_v61  ;;  %v3019_v61 = vrot.slane %v3017_v50, 1  ;;  %v4651_v62 = vld [vmem:[%s5142_s20 + $0x8] ss:$0 sps:$4 sm:$0x11]  }
  0x7f   : > { %4358 = vmatmul.mubr.msk.bf16.gmra.mxu0 %vm985_vm0, %v2114_v57  ;;  %4344 = vmatmul.mubr.msk.bf16.gmra.mxu1 %vm985_vm0, %v4591_v56  ;;  %v4627_v56 = vld [vmem:[%s4928_s26 + $0x8] ss:$0 sps:$4 sm:$0x11]   ;;  %v2471_v57 = vrot.slane %v4619_v51, 1  ;;  %v4650_v51 = vld [vmem:[%s5142_s20] sm:$0xff]   ;;  %s781_s26 = sand.u32 1, %s4724_s22  }
  0x80   : > { %4361 = vmatprep.mubr.msk.bf16.mxu0 %vm985_vm0, %v2134_v63  ;;  %4347 = vmatprep.mubr.msk.bf16.mxu1 %vm985_vm0, %v4594_v2  ;;  %v2462_v63 = vsel %vm1518_vm2, %v2460_v54, %v2461_v21  ;;  %v2937_v1 = vshll.u32 %v4627_v56, 16  ;;  %v2952_v2 = vshll.u32 %v4630_v55, 16  ;;  %v3303_v54 = vrot.slane %v4629_v35, 1  ;;  %s5522_s30 = scalar_lea.sflag [#allocation4], %s781_s26 }
  0x81   : > { %v2473_v4 = vsel %vm1518_vm2, %v2471_v57, %v2472_v58  ;;  %v3313_v55 = vrot.slane %v4632_v39, 1  ;;  %v3314_v21 = vrot.slane %v4633_v42, 1  ;;  %v2999_v56 = vrot.slane %v2997_v46, 1  ;;  %v4647_v58 = vld [vmem:[%s4999_s13 + $0x8] ss:$0 sps:$4 sm:$0x11]  }
  0x82   : > { %v2954_v12 = vrot.slane %v2952_v2, 1  ;;  %v2939_v15 = vrot.slane %v2937_v1, 1  ;;  %v4636_v1 = vld [vmem:[%s4965_s18] sm:$0xfe]   ;;  %v3050_v13 = vshrl.u32 %v4650_v51, 16  ;;  %v3347_v39 = vrot.slane %v4645_v29, 1 }
  0x83   : > { %v4637_v2 = vld [vmem:[%s4965_s18 + $0x8] ss:$0 sps:$4 sm:$0x11]   ;;  %v3315_v3 = vsel %vm1518_vm2, %v3313_v55, %v3314_v21 }
  0x84   : > { %v2955_v32 = vor.u32 %v2954_v12, %v2950_v7  ;;  %v3325_v17 = vrot.slane %v4637_v2, 1  ;;  %v4653_v46 = vld [vmem:[%s5175_s15 + $0x8] ss:$0 sps:$4 sm:$0x11]  }
  0x85   : > { %v3369_v50 = vrot.slane %v4653_v46, 1 }
  0x87   : > { %4362 = vmatmul.mubr.msk.bf16.gmra.mxu0 %vm985_vm0, %v2154_v16  ;;  %4348 = vmatmul.mubr.msk.bf16.gmra.mxu1 %vm985_vm0, %v4597_v19  ;;  %v4635_v16 = vld [vmem:[%s4944_s23 + $0x8] ss:$0 sps:$4 sm:$0x11]   ;;  %v4638_v19 = vld [vmem:[%s4965_s18] sm:$0xff]  }
  0x88   : > { %4365 = vmatprep.mubr.msk.bf16.mxu0 %vm985_vm0, %v2174_v10  ;;  %4371 = vmatprep.mubr.msk.bf16.mxu1 %vm985_vm0, %v2407_v24  ;;  %v2957_v10 = vshll.u32 %v4631_v5, 16  ;;  %v2940_v24 = vsel %vm1155_vm1, %v2935_v14, %v2939_v15  ;;  %v2977_v27 = vshll.u32 %v4635_v16, 16  ;;  %v4641_v5 = vld [vmem:[%s4975_s16 + $0x8] ss:$0 sps:$4 sm:$0x11]   ;;  %v3057_v15 = vshll.u32 %v4651_v62, 16 }
  0x89   : > { %v3324_v16 = vrot.slane %v4636_v1, 1 }
  0x8a   : > { %v2979_v60 = vrot.slane %v2977_v27, 1 }
  0x8b   : > { %v3326_v27 = vsel %vm1518_vm2, %v3324_v16, %v3325_v17 }
  0x8f   : > { %4366 = vmatmul.mubr.msk.bf16.gmra.mxu0 %vm985_vm0, %v2194_v33  ;;  %4372 = vmatmul.mubr.msk.bf16.vlgmr.msra.gmra.mxu1 %vm985_vm0, %v2418_v36  ;;  %v2959_v33 = vrot.slane %v2957_v10, 1  ;;  %v2992_v36 = vshll.u32 %v4638_v19, 16  ;;  %v3336_v10 = vrot.slane %v4641_v5, 1 }
  0x90   : > { %4389 = vmatprep.mubr.msk.bf16.mxu0 %vm985_vm0, %v4598_v34  ;;  %4406 = vmatpush3.bf16.msra.mxu1 %v5109_v31  ;;  %v2451_v31 = vsel %vm1518_vm2, %v2449_v44, %v2450_v45  ;;  %v4628_v34 = vld [vmem:[%s4939_s29] sm:$0xfe]   ;;  %v2990_v45 = vshrl.u32 %v4638_v19, 16  ;;  %s3953_s29 = sshll.u32 %s781_s26, 7 }
  0x91   : > { %4375 = vmatprep.mubr.msk.bf16.mxu1 %vm985_vm0, %v2429_v23  ;;  %v3012_v23 = vshll.u32 %v4642_v20, 16  ;;  %v2960_v44 = vsel %vm1155_vm1, %v2955_v32, %v2959_v33  ;;  %v2994_v47 = vrot.slane %v2992_v36, 1  ;;  %v4648_v32 = vld [vmem:[%s5142_s20] sm:$0xfe]  }
  0x92   : > { %v4649_v33 = vld [vmem:[%s5142_s20 + $0x8] ss:$0 sps:$4 sm:$0x11]  }
  0x93   : > { %v2995_v57 = vor.u32 %v2994_v47, %v2990_v45  ;;  %v4652_v45 = vld [vmem:[%s5175_s15] sm:$0xfe]  }
  0x97   : > { %4390 = vmatmul.mubr.msk.bf16.vlgmr.msra.gmra.mxu0 %vm985_vm0, %v4601_v40  ;;  %4376 = vmatmul.mubr.msk.bf16.gmra.mxu1 %vm985_vm0, %v2440_v49  ;;  %v2975_v40 = vor.u32 %v2974_v26, %v2970_v25  ;;  %v3014_v49 = vrot.slane %v3012_v23, 1  ;;  %v3059_v26 = vrot.slane %v3057_v15, 1 }
  0x98   : > { %4424 = vmatpush3.bf16.msra.mxu0 %v5122_v41  ;;  %4393 = vmatprep.mubr.msk.bf16.mxu0 %vm985_vm0, %v4606_v43  ;;  %v4622_v41 = vld [vmem:[%s5142_s20] sm:$0xfe]   ;;  %v3293_v43 = vsel %vm1518_vm2, %v3291_v28, %v3292_v30 }
  0x99   : > { %4379 = vmatprep.mubr.msk.bf16.mxu1 %vm985_vm0, %v2451_v31  ;;  %v2482_v9 = vrot.slane %v4622_v41, 1  ;;  %v4646_v31 = vld [vmem:[%s4999_s13] sm:$0xff]   ;;  %v2980_v52 = vsel %vm1155_vm1, %v2975_v40, %v2979_v60  ;;  %v3015_v41 = vor.u32 %v3014_v49, %v3010_v48  ;;  %v3357_v40 = vrot.slane %v4648_v32, 1 }
  0x9a   : > { %v3030_v7 = vshrl.u32 %v4646_v31, 16  ;;  %v4644_v28 = vld [vmem:[%s4999_s13] sm:$0xfe]   ;;  %v3358_v60 = vrot.slane %v4649_v33, 1  ;;  %v3368_v49 = vrot.slane %v4652_v45, 1  ;;  %s5663_s13 = sld [smem:[#allocation8_spill]] }
  0x9b   : > { %v2484_v22 = vsel %vm1518_vm2, %v2482_v9, %v2483_v11  ;;  %v3037_v9 = vshll.u32 %v4647_v58, 16  ;;  %v4654_v11 = vld [vmem:[%s5175_s15] sm:$0xff]   ;;  %v3020_v12 = vsel %vm1155_vm1, %v3015_v41, %v3019_v61 }
  0x9c   : > { %v3070_v35 = vshrl.u32 %v4654_v11, 16  ;;  %v3359_v47 = vsel %vm1518_vm2, %v3357_v40, %v3358_v60 }
  0x9d   : > { %v3039_v20 = vrot.slane %v3037_v9, 1 }
  0x9f   : > { %4394 = vmatmul.mubr.msk.bf16.gmra.mxu0 %vm985_vm0, %v4609_v53  ;;  %4380 = vmatmul.mubr.msk.bf16.gmra.mxu1 %vm985_vm0, %v2462_v63  ;;  %v3302_v53 = vrot.slane %v4628_v34, 1  ;;  %v3052_v63 = vshll.u32 %v4650_v51, 16 }
  0xa0   : > { %4397 = vmatprep.mubr.msk.bf16.mxu0 %vm985_vm0, %v4612_v59  ;;  %4383 = vmatprep.mubr.msk.bf16.mxu1 %vm985_vm0, %v2473_v4  ;;  %v3032_v59 = vshll.u32 %v4646_v31, 16  ;;  %v4640_v4 = vld [vmem:[%s4975_s16] sm:$0xfe]   ;;  %v3370_v31 = vsel %vm1518_vm2, %v3368_v49, %v3369_v50  ;;  %s5441_s16 = scalar_lea.vmem [#allocation3], %s3953_s29  ;;  %s4194_s12 = sshll.u32 %s5663_s13, 5 }
  0xa1   : > { %v3304_v0 = vsel %vm1518_vm2, %v3302_v53, %v3303_v54  ;;  %v3054_v14 = vrot.slane %v3052_v63, 1  ;;  %v3335_v18 = vrot.slane %v4640_v4, 1  ;;  %s3618_s14 = sadd.s32 %s4194_s12, %s4193_s17  ;;  %s3621_s19 = sshll.u32 %s5441_s16, 4  ;;  %s5515_s19 = int_to_ptr.vmem [resolvable:$true] %s3621_s19 }
  0xa2   : > { %s4195_s21 = sshll.u32 %s3618_s14, 7  ;;  %s4656_s25 = scalar_lea.vmem %s5515_s19, 2048 }
  0xa3   : > { %v3055_v25 = vor.u32 %v3054_v14, %v3050_v13  ;;  %v3337_v30 = vsel %vm1518_vm2, %v3335_v18, %v3336_v10  ;;  %s5513_s20 = scalar_lea.hbm %s5665_s4, %s4195_s21  ;;  %p4657_p11 = scmp.ne.s32.totalorder %s5515_s19, %s4656_s25 }
  0xa4   : > { %p4663_p0 = scmp.lt.s32.totalorder %s5515_s19, %s4661_s27  ;;  %p4664_p1 = scmp.lt.s32.totalorder %s4662_s28, %s4656_s25 }
  0xa5   : > { %v3060_v23 = vsel %vm1155_vm1, %v3055_v25, %v3059_v26  ;;  %p4658_p12 = pnand %p4657_p11, %p4869_p3 }
  0xa6   : > { %p4665_p2 = por %p4664_p1, %p4663_p0 }
  0xa7   : > { %4398 = vmatmul.mubr.msk.bf16.gmra.mxu0 %vm985_vm0, %v4615_v6  ;;  %4384 = vmatmul.mubr.msk.bf16.gmra.mxu1 %vm985_vm0, %v2484_v22  ;;  %v3000_v6 = vsel %vm1155_vm1, %v2995_v57, %v2999_v56  ;;  %v4655_v22 = vld [vmem:[%s5175_s15 + $0x8] ss:$0 sps:$4 sm:$0x11]   ;;  %p4659_p13 = pneg %p4658_p12 }
  0xa8   : > { %4401 = vmatprep.mubr.msk.bf16.mxu0 %vm985_vm0, %v4618_v8  ;;  %4407 = vmatprep.mubr.msk.bf16.mxu1 %vm985_vm0, %v2940_v24  ;;  %v3034_v8 = vrot.slane %v3032_v59, 1  ;;  %v3072_v24 = vshll.u32 %v4654_v11, 16  ;;  %v3077_v37 = vshll.u32 %v4655_v22, 16 }
  0xa9   : > { %p4666_p4 = pnand %p4665_p2, %p4659_p13 }
  0xaa   : > { %v3035_v19 = vor.u32 %v3034_v8, %v3030_v7  ;;  %v3074_v36 = vrot.slane %v3072_v24, 1 }
  0xac   : > { %v3040_v34 = vsel %vm1155_vm1, %v3035_v19, %v3039_v20  ;;  %v3075_v42 = vor.u32 %v3074_v36, %v3070_v35 }
  0xaf   : > { %4402 = vmatmul.mubr.msk.bf16.gmra.mxu0 %vm985_vm0, %v4621_v38  ;;  %4408 = vmatmul.mubr.msk.bf16.vlgmr.msra.gmra.mxu1 %vm985_vm0, %v2960_v44  ;;  %v3346_v38 = vrot.slane %v4644_v28, 1 }
  0xb0   : > { %4425 = vmatprep.mubr.msk.bf16.mxu0 %vm985_vm0, %v3293_v43  ;;  %4411 = vmatprep.mubr.msk.bf16.mxu1 %vm985_vm0, %v2980_v52  ;;  %v3079_v43 = vrot.slane %v3077_v37, 1 }
  0xb1   : > { %v3348_v44 = vsel %vm1518_vm2, %v3346_v38, %v3347_v39 }
  0xb2   : > { %v3080_v48 = vsel %vm1155_vm1, %v3075_v42, %v3079_v43 }
  0xb7   : > { %4426 = vmatmul.mubr.msk.bf16.vlgmr.msra.gmra.mxu0 %vm985_vm0, %v3304_v0  ;;  %4412 = vmatmul.mubr.msk.bf16.gmra.mxu1 %vm985_vm0, %v3000_v6 }
  0xb8   : > { %4429 = vmatprep.mubr.msk.bf16.mxu0 %vm985_vm0, %v3315_v3  ;;  %4415 = vmatprep.mubr.msk.bf16.mxu1 %vm985_vm0, %v3020_v12 }
  0xbf   : > { %4430 = vmatmul.mubr.msk.bf16.gmra.mxu0 %vm985_vm0, %v3326_v27  ;;  %4416 = vmatmul.mubr.msk.bf16.gmra.mxu1 %vm985_vm0, %v3040_v34 }
  0xc0   : > { %4433 = vmatprep.mubr.msk.bf16.mxu0 %vm985_vm0, %v3337_v30  ;;  %4419 = vmatprep.mubr.msk.bf16.mxu1 %vm985_vm0, %v3060_v23 }
  0xc7   : > { %4434 = vmatmul.mubr.msk.bf16.gmra.mxu0 %vm985_vm0, %v3348_v44  ;;  %4420 = vmatmul.mubr.msk.bf16.gmra.mxu1 %vm985_vm0, %v3080_v48 }
  0xc8   : > { %4437 = vmatprep.mubr.msk.bf16.mxu0 %vm985_vm0, %v3359_v47 }
  0xcf   : > { %4438 = vmatmul.mubr.msk.bf16.gmra.mxu0 %vm985_vm0, %v3370_v31 }
  0xff   : > { %v4291_v51 = vpop.f32.mrf.mxu1 }
 0x101   : > { %v1076_v52 = vpop.f32.mrf.mxu1 }
 0x103   : > { %v4292_v53 = vpop.f32.mrf.mxu1 }
 0x105   : > { %v1079_v54 = vpop.f32.mrf.mxu1 }
 0x107   : > { %v4295_v55 = vpop.f32.mrf.mxu1  ;;  %v4283_v21 = vpop.f32.mrf.mxu0 }
 0x109   : > { %v1092_v56 = vpop.f32.mrf.mxu1  ;;  %v1044_v57 = vpop.f32.mrf.mxu0 }
 0x10b   : > { %v4296_v58 = vpop.f32.mrf.mxu1  ;;  %v4284_v59 = vpop.f32.mrf.mxu0 }
 0x10d   : > { %v1047_v41 = vpop.f32.mrf.mxu0  ;;  %v1095_v61 = vpop.f32.mrf.mxu1 }
 0x10f   : > { %v4287_v62 = vpop.f32.mrf.mxu0  ;;  %v4301_v0 = vpop.f32.mrf.mxu1 }
 0x110   : > { %v1456_v1 = vadd.f32 %v4301_v0, %v4283_v21 }
 0x111   : > { %v1060_v63 = vpop.f32.mrf.mxu0  ;;  %v1375_v3 = vpop.f32.mrf.mxu1 }
 0x112   : > { %v1454_v4 = vadd.f32 %v1375_v3, %v1044_v57 }
 0x113   : > { %v4288_v2 = vpop.f32.mrf.mxu0  ;;  %v4302_v6 = vpop.f32.mrf.mxu1 }
 0x114   : > { %v1457_v7 = vadd.f32 %v4302_v6, %v4284_v59 }
 0x115   : > { %v1063_v5 = vpop.f32.mrf.mxu0  ;;  %v1378_v9 = vpop.f32.mrf.mxu1 }
 0x116   : > { %v1455_v11 = vadd.f32 %v1378_v9, %v1047_v41 }
 0x117   : > { %v4319_v8 = vpop.f32.mrf.mxu0  ;;  %v4305_v14 = vpop.f32.mrf.mxu1 }
 0x118   : > { %v5282_v12 = vadd.f32 %v4319_v8, %v1456_v1  ;;  %v1460_v15 = vadd.f32 %v4305_v14, %v4287_v62 }
 0x119   : > { %v1666_v13 = vpop.f32.mrf.mxu0  ;;  %v1391_v18 = vpop.f32.mrf.mxu1 }
 0x11a   : > { %v5284_v16 = vadd.f32 %v1666_v13, %v1454_v4  ;;  %v1458_v10 = vadd.f32 %v1391_v18, %v1060_v63 }
 0x11b   : > { %v4320_v17 = vpop.f32.mrf.mxu0  ;;  %v4306_v22 = vpop.f32.mrf.mxu1 }
 0x11c   : > { %v5286_v19 = vadd.f32 %v4320_v17, %v1457_v7  ;;  %v1461_v24 = vadd.f32 %v4306_v22, %v4288_v2 }
 0x11d   : > { %v1669_v20 = vpop.f32.mrf.mxu0  ;;  %v1394_v27 = vpop.f32.mrf.mxu1 }
 0x11e   : > { %v5288_v25 = vadd.f32 %v1669_v20, %v1455_v11  ;;  %v1459_v28 = vadd.f32 %v1394_v27, %v1063_v5 }
 0x11f   : > { %v4323_v26 = vpop.f32.mrf.mxu0  ;;  %v4309_v32 = vpop.f32.mrf.mxu1 }
 0x120   : > { %v5290_v29 = vadd.f32 %v4323_v26, %v1460_v15  ;;  %v1464_v33 = vadd.f32 %v4309_v32, %v4291_v51 }
 0x121   : > { %v1682_v30 = vpop.f32.mrf.mxu0  ;;  %v1407_v36 = vpop.f32.mrf.mxu1 }
 0x122   : > { %v5292_v34 = vadd.f32 %v1682_v30, %v1458_v10  ;;  %v1462_v37 = vadd.f32 %v1407_v36, %v1076_v52 }
 0x123   : > { %v4324_v35 = vpop.f32.mrf.mxu0  ;;  %v4310_v39 = vpop.f32.mrf.mxu1 }
 0x124   : > { %v5294_v23 = vadd.f32 %v4324_v35, %v1461_v24  ;;  %v1465_v40 = vadd.f32 %v4310_v39, %v4292_v53 }
 0x125   : > { %v1685_v38 = vpop.f32.mrf.mxu0  ;;  %v1410_v43 = vpop.f32.mrf.mxu1 }
 0x126   : > { %v5296_v60 = vadd.f32 %v1685_v38, %v1459_v28  ;;  %v1463_v44 = vadd.f32 %v1410_v43, %v1079_v54 }
 0x127   : > { %v4327_v42 = vpop.f32.mrf.mxu0  ;;  %v4313_v47 = vpop.f32.mrf.mxu1 }
 0x128   : > { %v5298_v45 = vadd.f32 %v4327_v42, %v1464_v33  ;;  %v1468_v48 = vadd.f32 %v4313_v47, %v4295_v55 }
 0x129   : > { %v1698_v46 = vpop.f32.mrf.mxu0  ;;  %v1423_v31 = vpop.f32.mrf.mxu1 }
 0x12a   : > { %v5300_v49 = vadd.f32 %v1698_v46, %v1462_v37  ;;  %v1466_v51 = vadd.f32 %v1423_v31, %v1092_v56 }
 0x12b   : > { %v4328_v50 = vpop.f32.mrf.mxu0  ;;  %v4314_v57 = vpop.f32.mrf.mxu1 }
 0x12c   : > { %v5302_v52 = vadd.f32 %v4328_v50, %v1465_v40  ;;  %v1469_v53 = vadd.f32 %v4314_v57, %v4296_v58 }
 0x12d   : > { %v1701_v21 = vpop.f32.mrf.mxu0  ;;  %v1426_v62 = vpop.f32.mrf.mxu1 }
 0x12e   : > { %v5304_v59 = vadd.f32 %v1701_v21, %v1463_v44  ;;  %v1467_v54 = vadd.f32 %v1426_v62, %v1095_v61 }
 0x12f   : > { %v4331_v41 = vpop.f32.mrf.mxu0  ;;  %v4337_v1 = vpop.f32.mrf.mxu1 }
 0x130   : > { %v5306_v63 = vadd.f32 %v4331_v41, %v1468_v48 }
 0x131   : > { %v1714_v0 = vpop.f32.mrf.mxu0  ;;  %v1900_v3 = vpop.f32.mrf.mxu1 }
 0x132   : > { %v5308_v55 = vadd.f32 %v1714_v0, %v1466_v51 }
 0x133   : > { %v4332_v2 = vpop.f32.mrf.mxu0  ;;  %v4338_v5 = vpop.f32.mrf.mxu1 }
 0x134   : > { %5625 = vst [vmem:[#allocation17_spill] sm:$0xff] %v5308_v55  ;;  %v5310_v4 = vadd.f32 %v4332_v2, %v1469_v53 }
 0x135   : > { %v1717_v56 = vpop.f32.mrf.mxu0  ;;  %v1903_v7 = vpop.f32.mrf.mxu1 }
 0x136   : > { %5626 = vst [vmem:[#allocation18_spill] sm:$0xff] %v5310_v4  ;;  %v5312_v6 = vadd.f32 %v1717_v56, %v1467_v54 }
 0x137   : > { %v4355_v58 = vpop.f32.mrf.mxu0  ;;  %v4341_v9 = vpop.f32.mrf.mxu1 }
 0x138   : > { %5627 = vst [vmem:[#allocation19_spill] sm:$0xff] %v5312_v6 }
 0x139   : > { %v2262_v8 = vpop.f32.mrf.mxu0  ;;  %v5316_v61 = vpop.f32.mrf.mxu1 }
 0x13b   : > { %v5314_v11 = vpop.f32.mrf.mxu0  ;;  %v5320_v14 = vpop.f32.mrf.mxu1 }
 0x13d   : > { %v5318_v13 = vpop.f32.mrf.mxu0  ;;  %v5324_v17 = vpop.f32.mrf.mxu1 }
 0x13f   : > { %v5322_v15 = vpop.f32.mrf.mxu0  ;;  %v5328_v10 = vpop.f32.mrf.mxu1 }
 0x141   : > { %v5326_v18 = vpop.f32.mrf.mxu0  ;;  %v5332_v22 = vpop.f32.mrf.mxu1 }
 0x143   : > { %v5330_v20 = vpop.f32.mrf.mxu0  ;;  %v5336_v26 = vpop.f32.mrf.mxu1 }
 0x145   : > { %v5334_v24 = vpop.f32.mrf.mxu0  ;;  %v5340_v28 = vpop.f32.mrf.mxu1 }
 0x147   : > { %v5338_v27 = vpop.f32.mrf.mxu0  ;;  %v5344_v32 = vpop.f32.mrf.mxu1 }
 0x149   : > { %v5342_v30 = vpop.f32.mrf.mxu0  ;;  %v5348_v35 = vpop.f32.mrf.mxu1 }
 0x14a   : > { %5629 = vst [vmem:[#allocation21_spill] sm:$0xff] %v5348_v35 }
 0x14b   : > { %v5346_v33 = vpop.f32.mrf.mxu0  ;;  %v5352_v37 = vpop.f32.mrf.mxu1 }
 0x14c   : > { %5628 = vst [vmem:[#allocation20_spill] sm:$0xff] %v5346_v33  ;;  %5631 = vst [vmem:[#allocation23_spill] sm:$0xff] %v5352_v37 }
 0x14d   : > { %v5350_v36 = vpop.f32.mrf.mxu0  ;;  %v5356_v39 = vpop.f32.mrf.mxu1 }
 0x14e   : > { %5630 = vst [vmem:[#allocation22_spill] sm:$0xff] %v5350_v36  ;;  %5633 = vst [vmem:[#allocation25_spill] sm:$0xff] %v5356_v39  ;;  %v1979_v36 = vadd.f32 %v1900_v3, %v5284_v16  ;;  %v1985_v16 = vadd.f32 %v4341_v9, %v5290_v29 }
 0x14f   : > { %v5354_v38 = vpop.f32.mrf.mxu0  ;;  %v4373_v42 = vpop.f32.mrf.mxu1 }
 0x150   : > { %5632 = vst [vmem:[#allocation24_spill] sm:$0xff] %v5354_v38  ;;  %v1981_v38 = vadd.f32 %v4337_v1, %v5282_v12  ;;  %v2341_v1 = vadd.f32 %v2262_v8, %v1979_v36  ;;  %v1986_v8 = vadd.f32 %v5320_v14, %v5294_v23 }
 0x151   : > { %v5358_v40 = vpop.f32.mrf.mxu0  ;;  %v2552_v44 = vpop.f32.mrf.mxu1 }
 0x152   : > { %5634 = vst [vmem:[#allocation26_spill] sm:$0xff] %v5358_v40  ;;  %v2343_v33 = vadd.f32 %v4355_v58, %v1981_v38  ;;  %v2631_v3 = vadd.f32 %v2552_v44, %v2341_v1  ;;  %v1983_v58 = vadd.f32 %v5316_v61, %v5292_v34  ;;  %v1984_v34 = vadd.f32 %v5324_v17, %v5296_v60  ;;  %v5430_v60 = vld [vmem:[%s5584_s11] ss:$0 sm:$0xff] }
 0x153   : > { %v5360_v43 = vpop.f32.mrf.mxu0  ;;  %v4374_v47 = vpop.f32.mrf.mxu1 }
 0x154   : > { %5635 = vst [vmem:[#allocation27_spill] sm:$0xff] %v5360_v43  ;;  %v2633_v12 = vadd.f32 %v4373_v42, %v2343_v33 }
 0x155   : > { %v5362_v46 = vpop.f32.mrf.mxu0  ;;  %v2555_v50 = vpop.f32.mrf.mxu1 }
 0x156   : > { %5636 = vst [vmem:[#allocation28_spill] sm:$0xff] %v5362_v46 }
 0x157   : > { %v4391_v48 = vpop.f32.mrf.mxu0  ;;  %v4377_v51 = vpop.f32.mrf.mxu1 }
 0x159   : > { %v2786_v31 = vpop.f32.mrf.mxu0  ;;  %v2568_v57 = vpop.f32.mrf.mxu1 }
 0x15a   : > { %v2865_v42 = vadd.f32 %v2786_v31, %v2631_v3  ;;  %v1987_v31 = vadd.f32 %v5332_v22, %v5300_v49 }
 0x15b   : > { %v4392_v21 = vpop.f32.mrf.mxu0  ;;  %v4378_v41 = vpop.f32.mrf.mxu1 }
 0x15d   : > { %v2789_v53 = vpop.f32.mrf.mxu0  ;;  %v5366_v54 = vpop.f32.mrf.mxu1 }
 0x15f   : > { %v5364_v62 = vpop.f32.mrf.mxu0  ;;  %v5370_v2 = vpop.f32.mrf.mxu1 }
 0x161   : > { %v5368_v0 = vpop.f32.mrf.mxu0  ;;  %v5374_v46 = vpop.f32.mrf.mxu1 }
 0x163   : > { %v5372_v56 = vpop.f32.mrf.mxu0  ;;  %v5378_v40 = vpop.f32.mrf.mxu1 }
 0x164   : > { %5638 = vst [vmem:[#allocation30_spill] sm:$0xff] %v5378_v40 }
 0x165   : > { %v5376_v43 = vpop.f32.mrf.mxu0  ;;  %v5382_v6 = vpop.f32.mrf.mxu1 }
 0x166   : > { %5637 = vst [vmem:[#allocation29_spill] sm:$0xff] %v5376_v43  ;;  %5640 = vst [vmem:[#allocation32_spill] sm:$0xff] %v5382_v6  ;;  %v1982_v43 = vadd.f32 %v4338_v5, %v5286_v19  ;;  %v1980_v6 = vadd.f32 %v1903_v7, %v5288_v25  ;;  %v2867_v7 = vadd.f32 %v4391_v48, %v2633_v12 }
 0x167   : > { %v5380_v39 = vpop.f32.mrf.mxu0  ;;  %v5387_v4 = vpop.f32.mrf.mxu1 }
 0x168   : > { %5639 = vst [vmem:[#allocation31_spill] sm:$0xff] %v5380_v39  ;;  %5642 = vst [vmem:[#allocation34_spill] sm:$0xff] %v5387_v4  ;;  %v2342_v25 = vadd.f32 %v5318_v13, %v1980_v6  ;;  %v2345_v13 = vadd.f32 %v5326_v18, %v1983_v58 }
 0x169   : > { %v5385_v37 = vpop.f32.mrf.mxu0  ;;  %v5392_v55 = vpop.f32.mrf.mxu1 }
 0x16a   : > { %5641 = vst [vmem:[#allocation33_spill] sm:$0xff] %v5385_v37  ;;  %5643 = vst [vmem:[#allocation35_spill] sm:$0xff] %v5392_v55  ;;  %v2344_v55 = vadd.f32 %v5314_v11, %v1982_v43  ;;  %v2632_v9 = vadd.f32 %v2555_v50, %v2342_v25  ;;  %v2347_v11 = vadd.f32 %v5322_v15, %v1985_v16 }
 0x16b   : > { %v5390_v35 = vpop.f32.mrf.mxu0  ;;  %v5397_v39 = vpop.f32.mrf.mxu1  ;;  %v1989_v43 = vadd.f32 %v5328_v10, %v5298_v45  ;;  %v2348_v15 = vadd.f32 %v5330_v20, %v1986_v8 }
 0x16c   : > { %v2634_v38 = vadd.f32 %v4374_v47, %v2344_v55  ;;  %v2637_v6 = vadd.f32 %v4377_v51, %v2347_v11  ;;  %v2635_v47 = vadd.f32 %v2568_v57, %v2345_v13  ;;  %v2866_v18 = vadd.f32 %v2789_v53, %v2632_v9  ;;  %v5648_v13 = vld [vmem:[#allocation30_spill] sm:$0xff] }
 0x16d   : > { %v5395_v40 = vpop.f32.mrf.mxu0  ;;  %v5402_v4 = vpop.f32.mrf.mxu1  ;;  %v2638_v51 = vadd.f32 %v4378_v41, %v2348_v15  ;;  %v1990_v57 = vadd.f32 %v5336_v26, %v5302_v52  ;;  %v2351_v53 = vadd.f32 %v5338_v27, %v1989_v43  ;;  %v1988_v52 = vadd.f32 %v5340_v28, %v5304_v59  ;;  %v5644_v59 = vld [vmem:[#allocation20_spill] sm:$0xff] }
 0x16e   : > { %v2868_v14 = vadd.f32 %v4392_v21, %v2634_v38  ;;  %v2346_v21 = vadd.f32 %v5334_v24, %v1984_v34  ;;  %v2871_v16 = vadd.f32 %v5364_v62, %v2637_v6  ;;  %v2869_v62 = vadd.f32 %v5368_v0, %v2635_v47  ;;  %v5647_v6 = vld [vmem:[#allocation21_spill] sm:$0xff] }
 0x16f   : > { %v5400_v37 = vpop.f32.mrf.mxu0  ;;  %v4409_v5 = vpop.f32.mrf.mxu1  ;;  %v2641_v26 = vadd.f32 %v5370_v2, %v2351_v53  ;;  %v2349_v27 = vadd.f32 %v5342_v30, %v1987_v31  ;;  %v2872_v8 = vadd.f32 %v5372_v56, %v2638_v51  ;;  %v1993_v0 = vadd.f32 %v5344_v32, %v5306_v63  ;;  %v5649_v63 = vld [vmem:[#allocation22_spill] sm:$0xff]  ;;  %v5653_v31 = vld [vmem:[#allocation32_spill] sm:$0xff]  ;;  %v5656_v53 = vld [vmem:[#allocation19_spill] sm:$0xff] }
 0x170   : > { %v3229_v36 = vadd.f32 %v4409_v5, %v2867_v7  ;;  %v2636_v3 = vadd.f32 %v5366_v54, %v2346_v21  ;;  %v2352_v28 = vadd.f32 %v5644_v59, %v1990_v57  ;;  %v2350_v32 = vadd.f32 %v5649_v63, %v1988_v52  ;;  %v5654_v21 = vld [vmem:[#allocation24_spill] sm:$0xff] }
 0x171   : > { %v5406_v19 = vpop.f32.mrf.mxu0  ;;  %v3148_v29 = vpop.f32.mrf.mxu1  ;;  %v5655_v57 = vld [vmem:[#allocation33_spill] sm:$0xff] }
 0x172   : > { %v3227_v23 = vadd.f32 %v3148_v29, %v2865_v42  ;;  %v2639_v29 = vadd.f32 %v5374_v46, %v2349_v27  ;;  %v5645_v42 = vld [vmem:[#allocation29_spill] sm:$0xff]  ;;  %v2640_v51 = vadd.f32 %v5653_v31, %v2350_v32 }
 0x173   : > { %v5413_v33 = vpop.f32.mrf.mxu0  ;;  %v4410_v61 = vpop.f32.mrf.mxu1  ;;  %v2870_v34 = vadd.f32 %v5645_v42, %v2636_v3 }
 0x174   : > { %v3230_v50 = vadd.f32 %v4410_v61, %v2868_v14  ;;  %v5646_v61 = vld [vmem:[#allocation17_spill] sm:$0xff]  ;;  %v2873_v3 = vadd.f32 %v5655_v57, %v2639_v29 }
 0x175   : > { %v5419_v55 = vpop.f32.mrf.mxu0  ;;  %v3151_v17 = vpop.f32.mrf.mxu1  ;;  %v1991_v56 = vadd.f32 %v5647_v6, %v5646_v61 }
 0x176   : > { %v3228_v1 = vadd.f32 %v3151_v17, %v2866_v18  ;;  %v5650_v17 = vld [vmem:[#allocation31_spill] sm:$0xff] }
 0x177   : > { %v4427_v44 = vpop.f32.mrf.mxu0  ;;  %v4413_v10 = vpop.f32.mrf.mxu1  ;;  %v2875_v47 = vadd.f32 %v5650_v17, %v2641_v26 }
 0x178   : > { %v3519_v48 = vadd.f32 %v4427_v44, %v3229_v36  ;;  %v3233_v41 = vadd.f32 %v4413_v10, %v2871_v16 }
 0x179   : > { %v3438_v45 = vpop.f32.mrf.mxu0  ;;  %v3164_v49 = vpop.f32.mrf.mxu1 }
 0x17a   : > { %v3574_v20 = vadd.f32 %v5430_v60, %v3519_v48  ;;  %v3517_v12 = vadd.f32 %v3438_v45, %v3227_v23  ;;  %v3231_v7 = vadd.f32 %v3164_v49, %v2869_v62  ;;  %v2642_v23 = vadd.f32 %v5648_v13, %v2352_v28  ;;  %v5651_v48 = vld [vmem:[#allocation18_spill] sm:$0xff] }
 0x17b   : > { %v4428_v5 = vpop.f32.mrf.mxu0  ;;  %v4414_v58 = vpop.f32.mrf.mxu1  ;;  %v2355_v45 = vadd.f32 %v5654_v21, %v1993_v0 }
 0x17c   : > { %3590 = vst [vmem:[%s5441_s16 + $0x10] sm:$0xff] %v3574_v20  ;;  %v3572_v22 = vadd.f32 %v5430_v60, %v3517_v12  ;;  %v3520_v24 = vadd.f32 %v4428_v5, %v3230_v50  ;;  %v3234_v36 = vadd.f32 %v4414_v58, %v2872_v8  ;;  %v5652_v50 = vld [vmem:[#allocation23_spill] sm:$0xff]  ;;  %v5657_v5 = vld [vmem:[#allocation25_spill] sm:$0xff] }
 0x17d   : > { %v3441_v54 = vpop.f32.mrf.mxu0  ;;  %v3167_v9 = vpop.f32.mrf.mxu1  ;;  %v1994_v18 = vadd.f32 %v5652_v50, %v5651_v48  ;;  %v1992_v49 = vadd.f32 %v5657_v5, %v5656_v53  ;;  %v5661_v8 = vld [vmem:[#allocation27_spill] sm:$0xff] }
 0x17e   : > { %3588 = vst [vmem:[%s5441_s16] sm:$0xff] %v3572_v22  ;;  %v3575_v38 = vadd.f32 %v5430_v60, %v3520_v24  ;;  %v3518_v25 = vadd.f32 %v3441_v54, %v3228_v1  ;;  %v3232_v44 = vadd.f32 %v3167_v9, %v2870_v34  ;;  %v5658_v22 = vld [vmem:[#allocation34_spill] sm:$0xff] }
 0x17f   : > { %v4431_v2 = vpop.f32.mrf.mxu0  ;;  %v4417_v14 = vpop.f32.mrf.mxu1  ;;  %v2645_v24 = vadd.f32 %v5658_v22, %v2355_v45  ;;  %v2356_v0 = vadd.f32 %v5661_v8, %v1994_v18 }
 0x180   : > { %3591 = vst [vmem:[%s5441_s16 + $0x18] sm:$0xff] %v3575_v38  ;;  %v3573_v30 = vadd.f32 %v5430_v60, %v3518_v25  ;;  %v3523_v11 = vadd.f32 %v4431_v2, %v3233_v41  ;;  %v3237_v16 = vadd.f32 %v4417_v14, %v2875_v47  ;;  %v5659_v41 = vld [vmem:[#allocation26_spill] sm:$0xff]  ;;  %v2876_v38 = vadd.f32 %v5390_v35, %v2642_v23  ;;  %v5660_v25 = vld [vmem:[#allocation35_spill] sm:$0xff] }
 0x181   : > { %v3454_v46 = vpop.f32.mrf.mxu0  ;;  %v3180_v20 = vpop.f32.mrf.mxu1  ;;  %v2353_v62 = vadd.f32 %v5659_v41, %v1991_v56  ;;  %v2879_v13 = vadd.f32 %v5400_v37, %v2645_v24 }
 0x182   : > { %3589 = vst [vmem:[%s5441_s16 + $0x8] sm:$0xff] %v3573_v30  ;;  %v3578_v43 = vadd.f32 %v5430_v60, %v3523_v11  ;;  %v3521_v15 = vadd.f32 %v3454_v46, %v3231_v7  ;;  %v3235_v58 = vadd.f32 %v3180_v20, %v2873_v3  ;;  %v2874_v30 = vadd.f32 %v5395_v40, %v2640_v51 }
 0x183   : > { %v4432_v10 = vpop.f32.mrf.mxu0  ;;  %v4418_v26 = vpop.f32.mrf.mxu1  ;;  %v2643_v7 = vadd.f32 %v5660_v25, %v2353_v62  ;;  %v2646_v11 = vadd.f32 %v5397_v39, %v2356_v0 }
 0x184   : > { %3594 = vst [vmem:[%s5441_s16 + $0x30] sm:$0xff] %v3578_v43  ;;  %v3576_v12 = vadd.f32 %v5430_v60, %v3521_v15  ;;  %v3524_v1 = vadd.f32 %v4432_v10, %v3234_v36  ;;  %v3238_v9 = vadd.f32 %v4418_v26, %v2876_v38  ;;  %v5662_v36 = vld [vmem:[#allocation28_spill] sm:$0xff] }
 0x185   : > { %v3457_v52 = vpop.f32.mrf.mxu0  ;;  %v3183_v59 = vpop.f32.mrf.mxu1  ;;  %v2354_v42 = vadd.f32 %v5662_v36, %v1992_v49  ;;  %v2877_v14 = vadd.f32 %v5406_v19, %v2643_v7 }
 0x186   : > { %3592 = vst [vmem:[%s5441_s16 + $0x20] sm:$0xff] %v3576_v12  ;;  %v3579_v27 = vadd.f32 %v5430_v60, %v3524_v1  ;;  %v3522_v54 = vadd.f32 %v3457_v52, %v3232_v44  ;;  %v3236_v56 = vadd.f32 %v3183_v59, %v2874_v30 }
 0x187   : > { %v4435_v29 = vpop.f32.mrf.mxu0  ;;  %v4421_v35 = vpop.f32.mrf.mxu1  ;;  %v2644_v23 = vadd.f32 %v5402_v4, %v2354_v42  ;;  %v2880_v4 = vadd.f32 %v5413_v33, %v2646_v11 }
 0x188   : > { %3595 = vst [vmem:[%s5441_s16 + $0x38] sm:$0xff] %v3579_v27  ;;  %v3577_v28 = vadd.f32 %v5430_v60, %v3522_v54  ;;  %v3527_v2 = vadd.f32 %v4435_v29, %v3237_v16  ;;  %v3241_v46 = vadd.f32 %v4421_v35, %v2879_v13 }
 0x189   : > { %v3470_v34 = vpop.f32.mrf.mxu0  ;;  %v3196_v40 = vpop.f32.mrf.mxu1  ;;  %v2878_v31 = vadd.f32 %v5419_v55, %v2644_v23 }
 0x18a   : > { %3593 = vst [vmem:[%s5441_s16 + $0x28] sm:$0xff] %v3577_v28  ;;  %v3582_v61 = vadd.f32 %v5430_v60, %v3527_v2  ;;  %v3525_v6 = vadd.f32 %v3470_v34, %v3235_v58  ;;  %v3239_v17 = vadd.f32 %v3196_v40, %v2877_v14 }
 0x18b   : > { %v4436_v63 = vpop.f32.mrf.mxu0  ;;  %v4422_v15 = vpop.f32.mrf.mxu1 }
 0x18c   : > { %3598 = vst [vmem:[%s5441_s16 + $0x50] sm:$0xff] %v3582_v61  ;;  %v3580_v39 = vadd.f32 %v5430_v60, %v3525_v6  ;;  %v3528_v32 = vadd.f32 %v4436_v63, %v3238_v9  ;;  %v3242_v18 = vadd.f32 %v4422_v15, %v2880_v4 }
 0x18d   : > { %v3473_v43 = vpop.f32.mrf.mxu0  ;;  %v3199_v48 = vpop.f32.mrf.mxu1 }
 0x18e   : > { %3596 = vst [vmem:[%s5441_s16 + $0x40] sm:$0xff] %v3580_v39  ;;  %v3583_v37 = vadd.f32 %v5430_v60, %v3528_v32  ;;  %v3526_v44 = vadd.f32 %v3473_v43, %v3236_v56  ;;  %v3240_v45 = vadd.f32 %v3199_v48, %v2878_v31 }
 0x18f   : > { %v4439_v47 = vpop.f32.mrf.mxu0 }
 0x190   : > { %3599 = vst [vmem:[%s5441_s16 + $0x58] sm:$0xff] %v3583_v37  ;;  %v3581_v50 = vadd.f32 %v5430_v60, %v3526_v44  ;;  %v3531_v19 = vadd.f32 %v4439_v47, %v3241_v46 }
 0x191   : > { %v3486_v51 = vpop.f32.mrf.mxu0 }
 0x192   : > { %3597 = vst [vmem:[%s5441_s16 + $0x48] sm:$0xff] %v3581_v50  ;;  %v3586_v33 = vadd.f32 %v5430_v60, %v3531_v19  ;;  %v3529_v21 = vadd.f32 %v3486_v51, %v3239_v17 }
 0x193   : > { %v4440_v10 = vpop.f32.mrf.mxu0 }
 0x194   : > { %3602 = vst [vmem:[%s5441_s16 + $0x70] sm:$0xff] %v3586_v33  ;;  %v3584_v20 = vadd.f32 %v5430_v60, %v3529_v21  ;;  %v3532_v12 = vadd.f32 %v4440_v10, %v3242_v18 }
 0x195   : > { %v3489_v1 = vpop.f32.mrf.mxu0 }
 0x196   : > { %3600 = vst [vmem:[%s5441_s16 + $0x60] sm:$0xff] %v3584_v20  ;;  %v3587_v55 = vadd.f32 %v5430_v60, %v3532_v12  ;;  %v3530_v16 = vadd.f32 %v3489_v1, %v3240_v45 }
 0x198   : > { %3603 = vst [vmem:[%s5441_s16 + $0x78] sm:$0xff] %v3587_v55  ;;  %v3585_v57 = vadd.f32 %v5430_v60, %v3530_v16 }
 0x19a   : > { %3601 = vst [vmem:[%s5441_s16 + $0x68] sm:$0xff] %v3585_v57 }
 0x19b   : > { %4669 = shalt.err (!%p4666_p4)
}
 0x19c   : > { %s4670_s15 = scalar_lea.hbm %s5513_s20, 2048  ;;  %s4674_s23 = scalar_lea.hbm %s5665_s4, 8192 }
 0x19d   : > { %p4671_p5 = scmp.ne.s32.totalorder %s5513_s20, %s4670_s15  ;;  %p4675_p9 = scmp.lt.s32.totalorder %s5513_s20, %s5665_s4 }
 0x19e   : > { %p4676_p10 = scmp.lt.s32.totalorder %s4674_s23, %s4670_s15 }
 0x19f   : > { %p4672_p6 = pnand %p4671_p5, %p4869_p3 }
 0x1a0   : > { %p4677_p11 = por %p4676_p10, %p4675_p9 }
 0x1a1   : > { %p4673_p7 = pneg %p4672_p6 }
 0x1a3   : > { %p4678_p12 = pnand %p4677_p11, %p4673_p7 }
 0x1a5   : > { %4681 = shalt.err (!%p4678_p12)
}
 0x1a6   : > { %s4751_s13 = smov 128   ;;  %s4752_s17 = smov 8  }
 0x1a7   : > { %4454 = dma.vmem_to_hbm [thread:$0]  (%p4869_p3), %s5515_s19, 2048, %s5513_s20, %s5522_s30, %s4751_s13, %s4751_s13, %s4752_s17  }
 0x1a8 PF: > { %s5666_s12 = sld [smem:[#allocation11_spill]] }
 0x1a9   : > { %s5667_s14 = sld [smem:[#allocation6_spill]] }
 0x1ae   : > { %p4460_p13 = scmp.ge.s32.totalorder %s5666_s12, 2 }
 0x1af   : > { %s3636_s3 = sand.u32 1, %s5667_s14  }
 0x1b0   : > { %p4457_p0 = pnand %p4460_p13, %p4878_p8  ;;  %s3637_s0 = scalar_lea.sflag [#allocation4], %s3636_s3 }
 0x1b2   : > { %p4458_p1 = pneg %p4457_p0 }
 0x1b4   : > { %4715 = dma.done.wait (%p4458_p1), %s3637_s0, 2048  }
 0x1b5   : > { %4717 = vsyncadd (%p4458_p1), %s3637_s0, 4294965248  ;;  %s25_s28 = sadd.s32 1, %s5666_s12   ;;  %s5669_s25 = sld [smem:[#allocation7_spill]] }
 0x1b6   : > { %p22_p2 = scmp.ge.s32.totalorder %s25_s28, 6   ;;  %s5670_s23 = sld [smem:[#allocation16_spill]] }
 0x1b7   : > { %s5671_s24 = sld [smem:[#allocation9_spill]]  ;;  %s5675_s21 = smov %s4724_s22 }
 0x1b8   : > { %s5672_s19 = sld [smem:[#allocation10_spill]] }
 0x1b9   : > { %s5673_s26 = sld [smem:[#allocation12_spill]] }
 0x1ba   : > { %s5674_s27 = sld [smem:[#allocation14_spill]]  ;;  %24 = sbr.rel (!%p22_p2) target bundleno = 11 (0xb), region = 144 }
 0x1bb   : > { %s5676_s22 = smov %s5669_s25 }
 0x1be   : > { %s5677_s25 = smov %s5672_s19 }
 0x1bf   :  { %3642 = vsyncpa [#allocation4], 1 }
 0x1c0   :  { %3644 = vsyncpa [#allocation4 + $0x1], 1 }

</bundles_post_ra>
